<compile_context>
chip_gen: v5e
topology: v5e:2x2
jax: 0.10.0
libtpu: 0.0.40
codegen_flags: <defaults>
</compile_context>

<pallas_src>
import jax
import jax.numpy as jnp
from jax import lax
from jax.experimental import pallas as pl
from jax.experimental.pallas import tpu as pltpu

B = 2
CIN = 3
H = W = 32              # 16*16*16 FC input implies 32x32 spatial input
K = 3
COUT = 16
HP = WP = 16            # after 2x2 max-pool
HPWP = HP * WP          # 256
FEAT = COUT * HPWP      # 4096
HID = 128
NCLS = 10
KKC = 32                # im2col contraction: K*K*CIN = 27 padded to 32
NK = 2                  # w1 K-tiles streamed over the grid (1 MB each)
CPS = COUT // NK        # conv-output channels consumed per grid step

assert NK * CPS * HPWP == FEAT


def fused_kernel(patches_ref, cw_ref, cb_ref, w1_ref, b1_ref, w2_ref, b2_ref,
                 out_ref, feat_ref, hacc_ref):
    kt = pl.program_id(0)
    ncols = patches_ref.shape[1]          # B * H * W
    nb = ncols // (H * W)

    # ---- step 0: conv (single channel-major im2col matmul) + bias + ReLU + 2x2 max-pool.
    #      Features land channel-major in VMEM and stay there. ----
    @pl.when(kt == 0)
    def _():
        hacc_ref[...] = jnp.zeros_like(hacc_ref)
        conv = jnp.dot(cw_ref[...], patches_ref[...],
                       preferred_element_type=jnp.float32)          # [COUT, B*1024]
        conv = jnp.maximum(conv + cb_ref[...], 0.0)
        # columns are ordered (b, hbit, wbit, ph*16+pw): the 2x2 pool is an elementwise max
        # of four lane-aligned 256-wide slices; result columns are torch (ph*16+pw) order.
        for b in range(nb):
            base = b * (H * W)
            q0 = conv[:, base + 0 * HPWP: base + 1 * HPWP]
            q1 = conv[:, base + 1 * HPWP: base + 2 * HPWP]
            q2 = conv[:, base + 2 * HPWP: base + 3 * HPWP]
            q3 = conv[:, base + 3 * HPWP: base + 4 * HPWP]
            feat_ref[:, b, :] = jnp.maximum(jnp.maximum(q0, q1),
                                            jnp.maximum(q2, q3))    # [COUT, 256]

    # ---- every step: FC1 contribution of CPS conv channels while the next
    #      [CPS*256, 128] slice of w1 streams in behind it ----
    h_part = jnp.zeros_like(hacc_ref)
    for cl in range(CPS):
        a_c = feat_ref[CPS * kt + cl]                                # [B, 256]
        w_c = w1_ref[cl * HPWP:(cl + 1) * HPWP, :]                   # [256, HID]
        h_part = h_part + jnp.dot(a_c, w_c, preferred_element_type=jnp.float32)
    hacc_ref[...] += h_part

    # ---- last step: bias + ReLU + FC2 ----
    @pl.when(kt == NK - 1)
    def _():
        hidden = jnp.maximum(hacc_ref[...] + b1_ref[...], 0.0)       # [B, HID]
        out_ref[...] = (jnp.dot(hidden, w2_ref[...],
                                preferred_element_type=jnp.float32) + b2_ref[...])


def conv_perceptron(x_nchw, conv_w, conv_b, w1, b1, w2, b2):
    bsz = x_nchw.shape[0]

    # cheap XLA glue (~0.3 MB): im2col patches, transposed to [K*K*CIN, B*H*W] with
    # column order (b, hbit, wbit, ph, pw) where h = 2*ph + hbit, w = 2*pw + wbit,
    # and (kh, kw, ci) contraction order padded 27 -> 32.
    x_nhwc = jnp.transpose(x_nchw, (0, 2, 3, 1))
    x_pad = jnp.pad(x_nhwc, ((0, 0), (1, 1), (1, 1), (0, 0)))
    slabs = [x_pad[:, kh:kh + H, kw:kw + W, :]
             for kh in range(K) for kw in range(K)]                  # each [B, H, W, CIN]
    pat = jnp.concatenate(slabs, axis=-1)                            # [B, H, W, 27]
    pat = pat.reshape(bsz, HP, 2, WP, 2, K * K * CIN)                # [b, ph, hbit, pw, wbit, kkc]
    pat = jnp.transpose(pat, (5, 0, 2, 4, 1, 3))                     # [kkc, b, hbit, wbit, ph, pw]
    patches_t = pat.reshape(K * K * CIN, bsz * H * W)
    patches_t = jnp.pad(patches_t, ((0, KKC - K * K * CIN), (0, 0)))  # [32, B*1024]

    cw_t = jnp.pad(conv_w.reshape(K * K * CIN, COUT),
                   ((0, KKC - K * K * CIN), (0, 0))).T               # [COUT, 32]

    grid_spec = pltpu.PrefetchScalarGridSpec(
        num_scalar_prefetch=0,
        grid=(NK,),
        in_specs=[
            pl.BlockSpec((KKC, bsz * H * W), lambda kt: (0, 0)),     # patches^T (resident)
            pl.BlockSpec((COUT, KKC), lambda kt: (0, 0)),            # conv weight (channel-major)
            pl.BlockSpec((COUT, 1), lambda kt: (0, 0)),              # conv bias
            pl.BlockSpec((CPS * HPWP, HID), lambda kt: (kt, 0)),     # w1: pipelined K-tiles
            pl.BlockSpec((1, HID), lambda kt: (0, 0)),               # b1
            pl.BlockSpec((HID, NCLS), lambda kt: (0, 0)),            # w2
            pl.BlockSpec((1, NCLS), lambda kt: (0, 0)),              # b2
        ],
        out_specs=pl.BlockSpec((bsz, NCLS), lambda kt: (0, 0)),
        scratch_shapes=[
            pltpu.VMEM((COUT, bsz, HPWP), jnp.float32),   # channel-major pooled features
            pltpu.VMEM((bsz, HID), jnp.float32),          # fc1 accumulator
        ],
    )

    return pl.pallas_call(
        fused_kernel,
        out_shape=jax.ShapeDtypeStruct((bsz, NCLS), jnp.float32),
        grid_spec=grid_spec,
        compiler_params=pltpu.CompilerParams(dimension_semantics=("arbitrary",)),
    )(patches_t, cw_t, conv_b.reshape(COUT, 1), w1, b1.reshape(1, HID),
      w2, b2.reshape(1, NCLS))


def reference(x_nchw, conv_w, conv_b, w1, b1, w2, b2):
    w_oihw = jnp.transpose(conv_w, (3, 2, 0, 1))
    y = lax.conv_general_dilated(
        x_nchw, w_oihw, window_strides=(1, 1), padding="SAME",
        dimension_numbers=("NCHW", "OIHW", "NCHW"),
        precision=lax.Precision.HIGHEST)
    y = jnp.maximum(y + conv_b[None, :, None, None], 0.0)
    y = lax.reduce_window(y, -jnp.inf, lax.max,
                          (1, 1, 2, 2), (1, 1, 2, 2), "VALID")
    f = y.reshape(y.shape[0], -1)
    h = jnp.maximum(jnp.dot(f, w1, precision=lax.Precision.HIGHEST) + b1, 0.0)
    return jnp.dot(h, w2, precision=lax.Precision.HIGHEST) + b2


if __name__ == "__main__":
    key = jax.random.PRNGKey(0)
    ks = jax.random.split(key, 7)
    x = jax.random.normal(ks[0], (B, CIN, H, W), jnp.float32)
    conv_w = jax.random.normal(ks[1], (K, K, CIN, COUT), jnp.float32) * 0.1
    conv_b = jax.random.normal(ks[2], (COUT,), jnp.float32) * 0.1
    w1 = jax.random.normal(ks[3], (FEAT, HID), jnp.float32) * 0.02
    b1 = jax.random.normal(ks[4], (HID,), jnp.float32) * 0.1
    w2 = jax.random.normal(ks[5], (HID, NCLS), jnp.float32) * 0.1
    b2 = jax.random.normal(ks[6], (NCLS,), jnp.float32) * 0.1

    out = jax.jit(conv_perceptron)(x, conv_w, conv_b, w1, b1, w2, b2)
    out = jax.block_until_ready(out)
    assert out.shape == (B, NCLS) and out.dtype == jnp.float32

    ref = reference(x, conv_w, conv_b, w1, b1, w2, b2)
    err = float(jnp.max(jnp.abs(out - ref)))
    assert jnp.allclose(out, ref, rtol=1e-2, atol=1e-2), f"max abs err {err}"
    print("KERNEL_OK")
</pallas_src>

<mosaic_0001>
module attributes {stable_mosaic.version = 11 : i64} {
  func.func @fused_kernel(%arg0: i32, %arg1: memref<32x2048xf32, #tpu.memory_space<vmem>>, %arg2: memref<16x32xf32, #tpu.memory_space<vmem>>, %arg3: memref<16x1xf32, #tpu.memory_space<vmem>>, %arg4: memref<2048x128xf32, #tpu.memory_space<vmem>>, %arg5: memref<1x128xf32, #tpu.memory_space<vmem>>, %arg6: memref<128x10xf32, #tpu.memory_space<vmem>>, %arg7: memref<1x10xf32, #tpu.memory_space<vmem>>, %arg8: memref<2x10xf32, #tpu.memory_space<vmem>>, %arg9: memref<16x2x256xf32, #tpu.memory_space<vmem>>, %arg10: memref<2x128xf32, #tpu.memory_space<vmem>>) attributes {dimension_semantics = [#tpu.dimension_semantics<arbitrary>], iteration_bounds = array<i64: 2>, scalar_prefetch = 0 : i64, scratch_operands = 2 : i64, tpu.core_type = #tpu.core_type<tc>, window_params = [{pipeline_mode = #tpu.pipeline_mode<synchronous>, transform_indices = @transform_0, window_bounds = array<i64: 32, 2048>}, {pipeline_mode = #tpu.pipeline_mode<synchronous>, transform_indices = @transform_1, window_bounds = array<i64: 16, 32>}, {pipeline_mode = #tpu.pipeline_mode<synchronous>, transform_indices = @transform_2, window_bounds = array<i64: 16, 1>}, {transform_indices = @transform_3, window_bounds = array<i64: 2048, 128>}, {pipeline_mode = #tpu.pipeline_mode<synchronous>, transform_indices = @transform_4, window_bounds = array<i64: 1, 128>}, {pipeline_mode = #tpu.pipeline_mode<synchronous>, transform_indices = @transform_5, window_bounds = array<i64: 128, 10>}, {pipeline_mode = #tpu.pipeline_mode<synchronous>, transform_indices = @transform_6, window_bounds = array<i64: 1, 10>}, {pipeline_mode = #tpu.pipeline_mode<synchronous>, transform_indices = @transform_7, window_bounds = array<i64: 2, 10>}]} {
    %c0_i32 = arith.constant 0 : i32
    %0 = arith.cmpi eq, %arg0, %c0_i32 : i32
    %1 = arith.extui %0 : i1 to i32
    %c0_i32_0 = arith.constant 0 : i32
    %2 = arith.cmpi ne, %1, %c0_i32_0 : i32
    scf.if %2 {
      %cst_47 = arith.constant 0.000000e+00 : f32
      %74 = vector.broadcast %cst_47 : f32 to vector<2x128xf32>
      %c0_48 = arith.constant 0 : index
      %c0_49 = arith.constant 0 : index
      %75 = vector.load %arg10[%c0_48, %c0_49] : memref<2x128xf32, #tpu.memory_space<vmem>>, vector<2x128xf32>
      tpu.vector_store %arg10[%c0_48, %c0_49], %74 {strides = array<i32>} : memref<2x128xf32, #tpu.memory_space<vmem>>, vector<2x128xf32>,
      %c0_50 = arith.constant 0 : index
      %c0_51 = arith.constant 0 : index
      %76 = vector.load %arg2[%c0_50, %c0_51] : memref<16x32xf32, #tpu.memory_space<vmem>>, vector<16x32xf32>
      %c0_52 = arith.constant 0 : index
      %c0_53 = arith.constant 0 : index
      %77 = vector.load %arg1[%c0_52, %c0_53] : memref<32x2048xf32, #tpu.memory_space<vmem>>, vector<32x2048xf32>
      %cst_54 = arith.constant dense<0.000000e+00> : vector<16x2048xf32>
      %78 = tpu.matmul %76, %77, %cst_54 {dimension_numbers = #tpu.dot_dimension_numbers<[1], [0], [0], [1], [0, 0, 1, 1], [], []>} : vector<16x32xf32>, vector<32x2048xf32>, vector<16x2048xf32> -> vector<16x2048xf32>
      %c0_55 = arith.constant 0 : index
      %c0_56 = arith.constant 0 : index
      %79 = vector.load %arg3[%c0_55, %c0_56] : memref<16x1xf32, #tpu.memory_space<vmem>>, vector<16x1xf32>
      %80 = vector.broadcast %79 : vector<16x1xf32> to vector<16x2048xf32>
      %81 = arith.addf %78, %80 : vector<16x2048xf32>
      %cst_57 = arith.constant 0.000000e+00 : f32
      %82 = vector.broadcast %cst_57 : f32 to vector<16x2048xf32>
      %83 = arith.maximumf %81, %82 : vector<16x2048xf32>
      %84 = vector.extract_strided_slice %83 {offsets = [0, 0], sizes = [16, 256], strides = [1, 1]} : vector<16x2048xf32> to vector<16x256xf32>
      %85 = vector.extract_strided_slice %83 {offsets = [0, 256], sizes = [16, 256], strides = [1, 1]} : vector<16x2048xf32> to vector<16x256xf32>
      %86 = vector.extract_strided_slice %83 {offsets = [0, 512], sizes = [16, 256], strides = [1, 1]} : vector<16x2048xf32> to vector<16x256xf32>
      %87 = vector.extract_strided_slice %83 {offsets = [0, 768], sizes = [16, 256], strides = [1, 1]} : vector<16x2048xf32> to vector<16x256xf32>
      %88 = arith.maximumf %84, %85 : vector<16x256xf32>
      %89 = arith.maximumf %86, %87 : vector<16x256xf32>
      %90 = arith.maximumf %88, %89 : vector<16x256xf32>
      %c0_58 = arith.constant 0 : index
      %c0_59 = arith.constant 0 : index
      %c0_60 = arith.constant 0 : index
      %91 = vector.load %arg9[%c0_58, %c0_59, %c0_60] : memref<16x2x256xf32, #tpu.memory_space<vmem>>, vector<16x1x256xf32>
      %92 = vector.shape_cast %91 : vector<16x1x256xf32> to vector<16x256xf32>
      %93 = vector.shape_cast %90 : vector<16x256xf32> to vector<16x1x256xf32>
      tpu.vector_store %arg9[%c0_58, %c0_59, %c0_60], %93 {strides = array<i32>} : memref<16x2x256xf32, #tpu.memory_space<vmem>>, vector<16x1x256xf32>,
      %94 = vector.extract_strided_slice %83 {offsets = [0, 1024], sizes = [16, 256], strides = [1, 1]} : vector<16x2048xf32> to vector<16x256xf32>
      %95 = vector.extract_strided_slice %83 {offsets = [0, 1280], sizes = [16, 256], strides = [1, 1]} : vector<16x2048xf32> to vector<16x256xf32>
      %96 = vector.extract_strided_slice %83 {offsets = [0, 1536], sizes = [16, 256], strides = [1, 1]} : vector<16x2048xf32> to vector<16x256xf32>
      %97 = vector.extract_strided_slice %83 {offsets = [0, 1792], sizes = [16, 256], strides = [1, 1]} : vector<16x2048xf32> to vector<16x256xf32>
      %98 = arith.maximumf %94, %95 : vector<16x256xf32>
      %99 = arith.maximumf %96, %97 : vector<16x256xf32>
      %100 = arith.maximumf %98, %99 : vector<16x256xf32>
      %c0_61 = arith.constant 0 : index
      %c1 = arith.constant 1 : index
      %c0_62 = arith.constant 0 : index
      %101 = vector.load %arg9[%c0_61, %c1, %c0_62] : memref<16x2x256xf32, #tpu.memory_space<vmem>>, vector<16x1x256xf32>
      %102 = vector.shape_cast %101 : vector<16x1x256xf32> to vector<16x256xf32>
      %103 = vector.shape_cast %100 : vector<16x256xf32> to vector<16x1x256xf32>
      tpu.vector_store %arg9[%c0_61, %c1, %c0_62], %103 {strides = array<i32>} : memref<16x2x256xf32, #tpu.memory_space<vmem>>, vector<16x1x256xf32>,
    } else {
    }
    %cst = arith.constant 0.000000e+00 : f32
    %3 = vector.broadcast %cst : f32 to vector<2x128xf32>
    %c8_i32 = arith.constant 8 : i32
    %4 = arith.muli %c8_i32, %arg0 : i32
    %c0_i32_1 = arith.constant 0 : i32
    %5 = arith.addi %4, %c0_i32_1 : i32
    %6 = arith.index_cast %5 : i32 to index
    %c0 = arith.constant 0 : index
    %c0_2 = arith.constant 0 : index
    %7 = vector.load %arg9[%6, %c0, %c0_2] : memref<16x2x256xf32, #tpu.memory_space<vmem>>, vector<1x2x256xf32>
    %8 = vector.shape_cast %7 : vector<1x2x256xf32> to vector<2x256xf32>
    %c0_3 = arith.constant 0 : index
    %c0_4 = arith.constant 0 : index
    %9 = vector.load %arg4[%c0_3, %c0_4] : memref<2048x128xf32, #tpu.memory_space<vmem>>, vector<256x128xf32>
    %cst_5 = arith.constant dense<0.000000e+00> : vector<2x128xf32>
    %10 = tpu.matmul %8, %9, %cst_5 {dimension_numbers = #tpu.dot_dimension_numbers<[1], [0], [0], [1], [0, 0, 1, 1], [], []>} : vector<2x256xf32>, vector<256x128xf32>, vector<2x128xf32> -> vector<2x128xf32>
    %11 = arith.addf %3, %10 : vector<2x128xf32>
    %c8_i32_6 = arith.constant 8 : i32
    %12 = arith.muli %c8_i32_6, %arg0 : i32
    %c1_i32 = arith.constant 1 : i32
    %13 = arith.addi %12, %c1_i32 : i32
    %14 = arith.index_cast %13 : i32 to index
    %c0_7 = arith.constant 0 : index
    %c0_8 = arith.constant 0 : index
    %15 = vector.load %arg9[%14, %c0_7, %c0_8] : memref<16x2x256xf32, #tpu.memory_space<vmem>>, vector<1x2x256xf32>
    %16 = vector.shape_cast %15 : vector<1x2x256xf32> to vector<2x256xf32>
    %c256 = arith.constant 256 : index
    %c0_9 = arith.constant 0 : index
    %17 = vector.load %arg4[%c256, %c0_9] : memref<2048x128xf32, #tpu.memory_space<vmem>>, vector<256x128xf32>
    %cst_10 = arith.constant dense<0.000000e+00> : vector<2x128xf32>
    %18 = tpu.matmul %16, %17, %cst_10 {dimension_numbers = #tpu.dot_dimension_numbers<[1], [0], [0], [1], [0, 0, 1, 1], [], []>} : vector<2x256xf32>, vector<256x128xf32>, vector<2x128xf32> -> vector<2x128xf32>
    %19 = arith.addf %11, %18 : vector<2x128xf32>
    %c8_i32_11 = arith.constant 8 : i32
    %20 = arith.muli %c8_i32_11, %arg0 : i32
    %c2_i32 = arith.constant 2 : i32
    %21 = arith.addi %20, %c2_i32 : i32
    %22 = arith.index_cast %21 : i32 to index
    %c0_12 = arith.constant 0 : index
    %c0_13 = arith.constant 0 : index
    %23 = vector.load %arg9[%22, %c0_12, %c0_13] : memref<16x2x256xf32, #tpu.memory_space<vmem>>, vector<1x2x256xf32>
    %24 = vector.shape_cast %23 : vector<1x2x256xf32> to vector<2x256xf32>
    %c512 = arith.constant 512 : index
    %c0_14 = arith.constant 0 : index
    %25 = vector.load %arg4[%c512, %c0_14] : memref<2048x128xf32, #tpu.memory_space<vmem>>, vector<256x128xf32>
    %cst_15 = arith.constant dense<0.000000e+00> : vector<2x128xf32>
    %26 = tpu.matmul %24, %25, %cst_15 {dimension_numbers = #tpu.dot_dimension_numbers<[1], [0], [0], [1], [0, 0, 1, 1], [], []>} : vector<2x256xf32>, vector<256x128xf32>, vector<2x128xf32> -> vector<2x128xf32>
    %27 = arith.addf %19, %26 : vector<2x128xf32>
    %c8_i32_16 = arith.constant 8 : i32
    %28 = arith.muli %c8_i32_16, %arg0 : i32
    %c3_i32 = arith.constant 3 : i32
    %29 = arith.addi %28, %c3_i32 : i32
    %30 = arith.index_cast %29 : i32 to index
    %c0_17 = arith.constant 0 : index
    %c0_18 = arith.constant 0 : index
    %31 = vector.load %arg9[%30, %c0_17, %c0_18] : memref<16x2x256xf32, #tpu.memory_space<vmem>>, vector<1x2x256xf32>
    %32 = vector.shape_cast %31 : vector<1x2x256xf32> to vector<2x256xf32>
    %c768 = arith.constant 768 : index
    %c0_19 = arith.constant 0 : index
    %33 = vector.load %arg4[%c768, %c0_19] : memref<2048x128xf32, #tpu.memory_space<vmem>>, vector<256x128xf32>
    %cst_20 = arith.constant dense<0.000000e+00> : vector<2x128xf32>
    %34 = tpu.matmul %32, %33, %cst_20 {dimension_numbers = #tpu.dot_dimension_numbers<[1], [0], [0], [1], [0, 0, 1, 1], [], []>} : vector<2x256xf32>, vector<256x128xf32>, vector<2x128xf32> -> vector<2x128xf32>
    %35 = arith.addf %27, %34 : vector<2x128xf32>
    %c8_i32_21 = arith.constant 8 : i32
    %36 = arith.muli %c8_i32_21, %arg0 : i32
    %c4_i32 = arith.constant 4 : i32
    %37 = arith.addi %36, %c4_i32 : i32
    %38 = arith.index_cast %37 : i32 to index
    %c0_22 = arith.constant 0 : index
    %c0_23 = arith.constant 0 : index
    %39 = vector.load %arg9[%38, %c0_22, %c0_23] : memref<16x2x256xf32, #tpu.memory_space<vmem>>, vector<1x2x256xf32>
    %40 = vector.shape_cast %39 : vector<1x2x256xf32> to vector<2x256xf32>
    %c1024 = arith.constant 1024 : index
    %c0_24 = arith.constant 0 : index
    %41 = vector.load %arg4[%c1024, %c0_24] : memref<2048x128xf32, #tpu.memory_space<vmem>>, vector<256x128xf32>
    %cst_25 = arith.constant dense<0.000000e+00> : vector<2x128xf32>
    %42 = tpu.matmul %40, %41, %cst_25 {dimension_numbers = #tpu.dot_dimension_numbers<[1], [0], [0], [1], [0, 0, 1, 1], [], []>} : vector<2x256xf32>, vector<256x128xf32>, vector<2x128xf32> -> vector<2x128xf32>
    %43 = arith.addf %35, %42 : vector<2x128xf32>
    %c8_i32_26 = arith.constant 8 : i32
    %44 = arith.muli %c8_i32_26, %arg0 : i32
    %c5_i32 = arith.constant 5 : i32
    %45 = arith.addi %44, %c5_i32 : i32
    %46 = arith.index_cast %45 : i32 to index
    %c0_27 = arith.constant 0 : index
    %c0_28 = arith.constant 0 : index
    %47 = vector.load %arg9[%46, %c0_27, %c0_28] : memref<16x2x256xf32, #tpu.memory_space<vmem>>, vector<1x2x256xf32>
    %48 = vector.shape_cast %47 : vector<1x2x256xf32> to vector<2x256xf32>
    %c1280 = arith.constant 1280 : index
    %c0_29 = arith.constant 0 : index
    %49 = vector.load %arg4[%c1280, %c0_29] : memref<2048x128xf32, #tpu.memory_space<vmem>>, vector<256x128xf32>
    %cst_30 = arith.constant dense<0.000000e+00> : vector<2x128xf32>
    %50 = tpu.matmul %48, %49, %cst_30 {dimension_numbers = #tpu.dot_dimension_numbers<[1], [0], [0], [1], [0, 0, 1, 1], [], []>} : vector<2x256xf32>, vector<256x128xf32>, vector<2x128xf32> -> vector<2x128xf32>
    %51 = arith.addf %43, %50 : vector<2x128xf32>
    %c8_i32_31 = arith.constant 8 : i32
    %52 = arith.muli %c8_i32_31, %arg0 : i32
    %c6_i32 = arith.constant 6 : i32
    %53 = arith.addi %52, %c6_i32 : i32
    %54 = arith.index_cast %53 : i32 to index
    %c0_32 = arith.constant 0 : index
    %c0_33 = arith.constant 0 : index
    %55 = vector.load %arg9[%54, %c0_32, %c0_33] : memref<16x2x256xf32, #tpu.memory_space<vmem>>, vector<1x2x256xf32>
    %56 = vector.shape_cast %55 : vector<1x2x256xf32> to vector<2x256xf32>
    %c1536 = arith.constant 1536 : index
    %c0_34 = arith.constant 0 : index
    %57 = vector.load %arg4[%c1536, %c0_34] : memref<2048x128xf32, #tpu.memory_space<vmem>>, vector<256x128xf32>
    %cst_35 = arith.constant dense<0.000000e+00> : vector<2x128xf32>
    %58 = tpu.matmul %56, %57, %cst_35 {dimension_numbers = #tpu.dot_dimension_numbers<[1], [0], [0], [1], [0, 0, 1, 1], [], []>} : vector<2x256xf32>, vector<256x128xf32>, vector<2x128xf32> -> vector<2x128xf32>
    %59 = arith.addf %51, %58 : vector<2x128xf32>
    %c8_i32_36 = arith.constant 8 : i32
    %60 = arith.muli %c8_i32_36, %arg0 : i32
    %c7_i32 = arith.constant 7 : i32
    %61 = arith.addi %60, %c7_i32 : i32
    %62 = arith.index_cast %61 : i32 to index
    %c0_37 = arith.constant 0 : index
    %c0_38 = arith.constant 0 : index
    %63 = vector.load %arg9[%62, %c0_37, %c0_38] : memref<16x2x256xf32, #tpu.memory_space<vmem>>, vector<1x2x256xf32>
    %64 = vector.shape_cast %63 : vector<1x2x256xf32> to vector<2x256xf32>
    %c1792 = arith.constant 1792 : index
    %c0_39 = arith.constant 0 : index
    %65 = vector.load %arg4[%c1792, %c0_39] : memref<2048x128xf32, #tpu.memory_space<vmem>>, vector<256x128xf32>
    %cst_40 = arith.constant dense<0.000000e+00> : vector<2x128xf32>
    %66 = tpu.matmul %64, %65, %cst_40 {dimension_numbers = #tpu.dot_dimension_numbers<[1], [0], [0], [1], [0, 0, 1, 1], [], []>} : vector<2x256xf32>, vector<256x128xf32>, vector<2x128xf32> -> vector<2x128xf32>
    %67 = arith.addf %59, %66 : vector<2x128xf32>
    %c0_41 = arith.constant 0 : index
    %c0_42 = arith.constant 0 : index
    %68 = vector.load %arg10[%c0_41, %c0_42] : memref<2x128xf32, #tpu.memory_space<vmem>>, vector<2x128xf32>
    %69 = arith.addf %68, %67 : vector<2x128xf32>
    %c0_43 = arith.constant 0 : index
    %c0_44 = arith.constant 0 : index
    %70 = vector.load %arg10[%c0_43, %c0_44] : memref<2x128xf32, #tpu.memory_space<vmem>>, vector<2x128xf32>
    tpu.vector_store %arg10[%c0_43, %c0_44], %69 {strides = array<i32>} : memref<2x128xf32, #tpu.memory_space<vmem>>, vector<2x128xf32>,
    %c1_i32_45 = arith.constant 1 : i32
    %71 = arith.cmpi eq, %arg0, %c1_i32_45 : i32
    %72 = arith.extui %71 : i1 to i32
    %c0_i32_46 = arith.constant 0 : i32
    %73 = arith.cmpi ne, %72, %c0_i32_46 : i32
    scf.if %73 {
      %c0_47 = arith.constant 0 : index
      %c0_48 = arith.constant 0 : index
      %74 = vector.load %arg10[%c0_47, %c0_48] : memref<2x128xf32, #tpu.memory_space<vmem>>, vector<2x128xf32>
      %c0_49 = arith.constant 0 : index
      %c0_50 = arith.constant 0 : index
      %75 = vector.load %arg5[%c0_49, %c0_50] : memref<1x128xf32, #tpu.memory_space<vmem>>, vector<1x128xf32>
      %76 = vector.broadcast %75 : vector<1x128xf32> to vector<2x128xf32>
      %77 = arith.addf %74, %76 : vector<2x128xf32>
      %cst_51 = arith.constant 0.000000e+00 : f32
      %78 = vector.broadcast %cst_51 : f32 to vector<2x128xf32>
      %79 = arith.maximumf %77, %78 : vector<2x128xf32>
      %c0_52 = arith.constant 0 : index
      %c0_53 = arith.constant 0 : index
      %80 = vector.load %arg6[%c0_52, %c0_53] : memref<128x10xf32, #tpu.memory_space<vmem>>, vector<128x10xf32>
      %cst_54 = arith.constant dense<0.000000e+00> : vector<2x10xf32>
      %81 = tpu.matmul %79, %80, %cst_54 {dimension_numbers = #tpu.dot_dimension_numbers<[1], [0], [0], [1], [0, 0, 1, 1], [], []>} : vector<2x128xf32>, vector<128x10xf32>, vector<2x10xf32> -> vector<2x10xf32>
      %c0_55 = arith.constant 0 : index
      %c0_56 = arith.constant 0 : index
      %82 = vector.load %arg7[%c0_55, %c0_56] : memref<1x10xf32, #tpu.memory_space<vmem>>, vector<1x10xf32>
      %83 = vector.broadcast %82 : vector<1x10xf32> to vector<2x10xf32>
      %84 = arith.addf %81, %83 : vector<2x10xf32>
      %c0_57 = arith.constant 0 : index
      %c0_58 = arith.constant 0 : index
      %85 = vector.load %arg8[%c0_57, %c0_58] : memref<2x10xf32, #tpu.memory_space<vmem>>, vector<2x10xf32>
      tpu.vector_store %arg8[%c0_57, %c0_58], %84 {strides = array<i32>} : memref<2x10xf32, #tpu.memory_space<vmem>>, vector<2x10xf32>,
    } else {
    }
    return
  }
  func.func @transform_0(%arg0: i32) -> (i32, i32) {
    %c0_i32 = arith.constant 0 : i32
    %c0_i32_0 = arith.constant 0 : i32
    %c0_i32_1 = arith.constant 0 : i32
    return %c0_i32, %c0_i32_0 : i32, i32
  }
  func.func @transform_1(%arg0: i32) -> (i32, i32) {
    %c0_i32 = arith.constant 0 : i32
    %c0_i32_0 = arith.constant 0 : i32
    %c0_i32_1 = arith.constant 0 : i32
    return %c0_i32, %c0_i32_0 : i32, i32
  }
  func.func @transform_2(%arg0: i32) -> (i32, i32) {
    %c0_i32 = arith.constant 0 : i32
    %c0_i32_0 = arith.constant 0 : i32
    %c0_i32_1 = arith.constant 0 : i32
    return %c0_i32, %c0_i32_0 : i32, i32
  }
  func.func @transform_3(%arg0: i32) -> (i32, i32) {
    %c0_i32 = arith.constant 0 : i32
    %c0_i32_0 = arith.constant 0 : i32
    return %arg0, %c0_i32 : i32, i32
  }
  func.func @transform_4(%arg0: i32) -> (i32, i32) {
    %c0_i32 = arith.constant 0 : i32
    %c0_i32_0 = arith.constant 0 : i32
    %c0_i32_1 = arith.constant 0 : i32
    return %c0_i32, %c0_i32_0 : i32, i32
  }
  func.func @transform_5(%arg0: i32) -> (i32, i32) {
    %c0_i32 = arith.constant 0 : i32
    %c0_i32_0 = arith.constant 0 : i32
    %c0_i32_1 = arith.constant 0 : i32
    return %c0_i32, %c0_i32_0 : i32, i32
  }
  func.func @transform_6(%arg0: i32) -> (i32, i32) {
    %c0_i32 = arith.constant 0 : i32
    %c0_i32_0 = arith.constant 0 : i32
    %c0_i32_1 = arith.constant 0 : i32
    return %c0_i32, %c0_i32_0 : i32, i32
  }
  func.func @transform_7(%arg0: i32) -> (i32, i32) {
    %c0_i32 = arith.constant 0 : i32
    %c0_i32_0 = arith.constant 0 : i32
    %c0_i32_1 = arith.constant 0 : i32
    return %c0_i32, %c0_i32_0 : i32, i32
  }
}

</mosaic_0001>

<bundles_post_ra>
// kernel: conv_perceptron.1
= control target key start
LH: loop header
LB: loop body
LE: loop exit
PB: predicated region body
PF: predicated region fallthrough
CT: control target
= control target key end

     0   :  { %12 = vsyncpa [#allocation5], 0  ;;  %s1944_s24 = smov 0   ;;  %s2722_s0 = inlined_call_operand.vmem [shape: f32[32,2048], index: 0, kind: input, shape index: {}]   ;;  %s2723_s1 = inlined_call_operand.vmem [shape: f32[16,32], index: 1, kind: input, shape index: {}]   ;;  %s2724_s2 = inlined_call_operand.vmem [shape: f32[16,1], index: 2, kind: input, shape index: {}]   ;;  %s2725_s3 = inlined_call_operand.vmem [shape: f32[4096,128], index: 3, kind: input, shape index: {}]   ;;  %s2726_s4 = inlined_call_operand.vmem [shape: f32[1,128], index: 4, kind: input, shape index: {}]   ;;  %s2727_s5 = inlined_call_operand.vmem [shape: f32[128,10], index: 5, kind: input, shape index: {}]   ;;  %s2728_s6 = inlined_call_operand.vmem [shape: f32[1,10], index: 6, kind: input, shape index: {}]   ;;  %s2729_s7 = inlined_call_operand.hbm [shape: f32[2,10], index: 7, kind: output, shape index: {}]  }
   0x1 LB: > { %s1950_s25 = sadd.s32 4294967295, %s1899_s24   ;;  %p1767_p0 = scmp.ge.s32.totalorder %s1899_s24, 1  ;;  %s1899_s24 = sphi %s1944_s24, %s18_s24  }
   0x2   : > { %p234_p1 = scmp.lt.s32.totalorder %s1899_s24, 3 }
   0x4   : > { %p235_p2 = pnand %p1767_p0, %p234_p1 }
   0x5   : > { %s1768_s26 = sshll.u32 (!%p235_p2), %s1950_s25, 8  ;;  %p1770_p4 = scmp.ne.s32.totalorder (!%p235_p2), %s1950_s25, 0 }
   0x6   : > { %238 = sbr.rel (%p235_p2) target bundleno = 680 (0x2a8), region = 48  ;;  %p262_p3 = scmp.lt.s32.totalorder (!%p235_p2), %s1768_s26, 511 }
   0xb   : > { %s2733_s26 = smov (!%p262_p3, %s1768_s26), 511  ;;  %270 = sbr.rel (%p1770_p4) target bundleno = 238 (0xee), region = 52 }
   0xc   : > { %s1769_s27 = sshll.u32 %s2733_s26, 3 }
   0xd   : > { %s1958_s30 = scalar_lea.vmem %s2725_s3, %s1769_s27 }
  0x10   : > { %v322_v0 = vld [vmem:[%s2722_s0 + $0x180] sm:$0xff]  ;;  %v323_v1 = vld [vmem:[%s2722_s0 + $0x188] sm:$0xff]  ;;  %v324_v2 = vld [vmem:[%s2722_s0 + $0x190] sm:$0xff]  ;;  %v1901_v3 = vmov 0.0   ;;  %vm350_vm0 = vcmask 261120   ;;  %v1902_v40 = vmov 0  }
  0x11   : > { %271 = vst [vmem:[#allocation3] sm:$0x3] %v1901_v3  ;;  %369 = vmatpush.msra.mxu0 %v322_v0  ;;  %392 = vmatpush.msra.mxu1 %v323_v1  ;;  %v325_v4 = vld [vmem:[%s2722_s0 + $0x198] sm:$0xff]  ;;  %v306_v5 = vld [vmem:[%s2722_s0 + $0x100] sm:$0xff]  ;;  %v307_v6 = vld [vmem:[%s2722_s0 + $0x108] sm:$0xff]  ;;  %vm775_vm1 = vcmask 1040384  }
  0x12   : > { %415 = vmatpush.msra.mxu2 %v324_v2  ;;  %438 = vmatpush.msra.mxu3 %v325_v4  ;;  %v308_v7 = vld [vmem:[%s2722_s0 + $0x110] sm:$0xff]  ;;  %v309_v8 = vld [vmem:[%s2722_s0 + $0x118] sm:$0xff]  ;;  %v290_v9 = vld [vmem:[%s2722_s0 + $0x80] sm:$0xff]  ;;  %vm777_vm2 = vcmask 1041409   ;;  %vm780_vm3 = vcmask 1042434   ;;  %vm783_vm4 = vcmask 1043459  }
  0x13   : > { %370 = vmatpush.msra.mxu0 %v306_v5  ;;  %393 = vmatpush.msra.mxu1 %v307_v6  ;;  %v291_v10 = vld [vmem:[%s2722_s0 + $0x88] sm:$0xff]  ;;  %v292_v11 = vld [vmem:[%s2722_s0 + $0x90] sm:$0xff]  ;;  %v293_v12 = vld [vmem:[%s2722_s0 + $0x98] sm:$0xff]  ;;  %vm786_vm5 = vcmask 1044484   ;;  %vm789_vm6 = vcmask 1045509   ;;  %vm792_vm7 = vcmask 1046534  }
  0x14   : > { %416 = vmatpush.msra.mxu2 %v308_v7  ;;  %439 = vmatpush.msra.mxu3 %v309_v8  ;;  %v274_v13 = vld [vmem:[%s2722_s0] sm:$0xff]  ;;  %v275_v14 = vld [vmem:[%s2722_s0 + $0x8] sm:$0xff]  ;;  %v276_v15 = vld [vmem:[%s2722_s0 + $0x10] sm:$0xff]  ;;  %vm795_vm8 = vcmask 1046528  }
  0x15   : > { %371 = vmatpush.msra.mxu0 %v290_v9  ;;  %394 = vmatpush.msra.mxu1 %v291_v10  ;;  %v277_v16 = vld [vmem:[%s2722_s0 + $0x18] sm:$0xff]  ;;  %v2012_v17 = vld [vmem:[%s2723_s1] sm:$0xff]  ;;  %v328_v19 = vld [vmem:[%s2722_s0 + $0x1b0] sm:$0xff] }
  0x16   : > { %417 = vmatpush.msra.mxu2 %v292_v11  ;;  %440 = vmatpush.msra.mxu3 %v293_v12  ;;  %v329_v18 = vld [vmem:[%s2722_s0 + $0x1b8] sm:$0xff]  ;;  %v327_v20 = vld [vmem:[%s2722_s0 + $0x1a8] sm:$0xff]  ;;  %v326_v21 = vld [vmem:[%s2722_s0 + $0x1a0] sm:$0xff] }
  0x17   : > { %372 = vmatpush.msra.mxu0 %v274_v13  ;;  %395 = vmatpush.msra.mxu1 %v275_v14  ;;  %v313_v22 = vld [vmem:[%s2722_s0 + $0x138] sm:$0xff]  ;;  %v312_v23 = vld [vmem:[%s2722_s0 + $0x130] sm:$0xff]  ;;  %v311_v24 = vld [vmem:[%s2722_s0 + $0x128] sm:$0xff] }
  0x18   : > { %418 = vmatpush.msra.mxu2 %v276_v15  ;;  %441 = vmatpush.msra.mxu3 %v277_v16  ;;  %v310_v25 = vld [vmem:[%s2722_s0 + $0x120] sm:$0xff]  ;;  %v297_v26 = vld [vmem:[%s2722_s0 + $0xb8] sm:$0xff]  ;;  %v296_v27 = vld [vmem:[%s2722_s0 + $0xb0] sm:$0xff] }
  0x19   : > { %1771 = vmatmul.msk.f32.vlgmr.msra.gmra.mxu0 %vm350_vm0, %v2012_v17  ;;  %1773 = vmatmul.msk.f32.vlgmr.msra.gmra.mxu1 %vm350_vm0, %v2012_v17  ;;  %v294_v28 = vld [vmem:[%s2722_s0 + $0xa0] sm:$0xff]  ;;  %v295_v29 = vld [vmem:[%s2722_s0 + $0xa8] sm:$0xff]  ;;  %v281_v31 = vld [vmem:[%s2722_s0 + $0x38] sm:$0xff] }
  0x1a   : > { %1775 = vmatmul.msk.f32.vlgmr.msra.gmra.mxu2 %vm350_vm0, %v2012_v17  ;;  %1777 = vmatmul.msk.f32.vlgmr.msra.gmra.mxu3 %vm350_vm0, %v2012_v17  ;;  %v2061_v30 = vld [vmem:[%s2723_s1 + $0x8] sm:$0xff]  ;;  %v280_v32 = vld [vmem:[%s2722_s0 + $0x30] sm:$0xff]  ;;  %v278_v33 = vld [vmem:[%s2722_s0 + $0x20] sm:$0xff] }
  0x1b   : > { %530 = vmatpush.msrb.mxu3 %v329_v18  ;;  %507 = vmatpush.msrb.mxu2 %v328_v19  ;;  %v279_v34 = vld [vmem:[%s2722_s0 + $0x28] sm:$0xff]  ;;  %v333_v35 = vld [vmem:[%s2722_s0 + $0x1d8] sm:$0xff]  ;;  %v338_v36 = vld [vmem:[%s2724_s2] sm:$0xff] }
  0x1c   : > { %484 = vmatpush.msrb.mxu1 %v327_v20  ;;  %461 = vmatpush.msrb.mxu0 %v326_v21  ;;  %v332_v37 = vld [vmem:[%s2722_s0 + $0x1d0] sm:$0xff]  ;;  %v317_v38 = vld [vmem:[%s2722_s0 + $0x158] sm:$0xff]  ;;  %v331_v39 = vld [vmem:[%s2722_s0 + $0x1c8] sm:$0xff] }
  0x1d   : > { %531 = vmatpush.msrb.mxu3 %v313_v22  ;;  %508 = vmatpush.msrb.mxu2 %v312_v23  ;;  %v316_v41 = vld [vmem:[%s2722_s0 + $0x150] sm:$0xff]  ;;  %v330_v42 = vld [vmem:[%s2722_s0 + $0x1c0] sm:$0xff]  ;;  %v301_v43 = vld [vmem:[%s2722_s0 + $0xd8] sm:$0xff] }
  0x1e   : > { %485 = vmatpush.msrb.mxu1 %v311_v24  ;;  %462 = vmatpush.msrb.mxu0 %v310_v25  ;;  %v315_v44 = vld [vmem:[%s2722_s0 + $0x148] sm:$0xff]  ;;  %v300_v45 = vld [vmem:[%s2722_s0 + $0xd0] sm:$0xff]  ;;  %v314_v46 = vld [vmem:[%s2722_s0 + $0x140] sm:$0xff] }
  0x1f   : > { %532 = vmatpush.msrb.mxu3 %v297_v26  ;;  %509 = vmatpush.msrb.mxu2 %v296_v27  ;;  %v285_v47 = vld [vmem:[%s2722_s0 + $0x58] sm:$0xff]  ;;  %v299_v48 = vld [vmem:[%s2722_s0 + $0xc8] sm:$0xff]  ;;  %v298_v50 = vld [vmem:[%s2722_s0 + $0xc0] sm:$0xff] }
  0x20   : > { %463 = vmatpush.msrb.mxu0 %v294_v28  ;;  %486 = vmatpush.msrb.mxu1 %v295_v29  ;;  %v339_v49 = vld [vmem:[%s2724_s2 + $0x8] sm:$0xff]  ;;  %v284_v51 = vld [vmem:[%s2722_s0 + $0x50] sm:$0xff]  ;;  %v282_v53 = vld [vmem:[%s2722_s0 + $0x40] sm:$0xff] }
  0x21   : > { %1772 = vmatmul.msk.f32.gmra.mxu0 %vm350_vm0, %v2061_v30  ;;  %1774 = vmatmul.msk.f32.gmra.mxu1 %vm350_vm0, %v2061_v30  ;;  %v283_v52 = vld [vmem:[%s2722_s0 + $0x48] sm:$0xff]  ;;  %v337_v54 = vld [vmem:[%s2722_s0 + $0x1f8] sm:$0xff]  ;;  %v336_v55 = vld [vmem:[%s2722_s0 + $0x1f0] sm:$0xff] }
  0x22   : > { %1776 = vmatmul.msk.f32.gmra.mxu2 %vm350_vm0, %v2061_v30  ;;  %1778 = vmatmul.msk.f32.gmra.mxu3 %vm350_vm0, %v2061_v30  ;;  %v321_v56 = vld [vmem:[%s2722_s0 + $0x178] sm:$0xff]  ;;  %v335_v57 = vld [vmem:[%s2722_s0 + $0x1e8] sm:$0xff]  ;;  %v334_v58 = vld [vmem:[%s2722_s0 + $0x1e0] sm:$0xff] }
  0x23   : > { %533 = vmatpush.msrb.mxu3 %v281_v31  ;;  %510 = vmatpush.msrb.mxu2 %v280_v32  ;;  %v320_v59 = vld [vmem:[%s2722_s0 + $0x170] sm:$0xff]  ;;  %v305_v60 = vld [vmem:[%s2722_s0 + $0xf8] sm:$0xff]  ;;  %v319_v61 = vld [vmem:[%s2722_s0 + $0x168] sm:$0xff] }
  0x24   : > { %464 = vmatpush.msrb.mxu0 %v278_v33  ;;  %487 = vmatpush.msrb.mxu1 %v279_v34  ;;  %v318_v62 = vld [vmem:[%s2722_s0 + $0x160] sm:$0xff]  ;;  %v304_v63 = vld [vmem:[%s2722_s0 + $0xf0] sm:$0xff]  ;;  %v289_v0 = vld [vmem:[%s2722_s0 + $0x78] sm:$0xff] }
  0x25   : > { %1858 = vset.pattern.permute.xlu0 %v1902_v40  ;;  %622 = vmatpush.msra.mxu3 %v333_v35  ;;  %v302_v1 = vld [vmem:[%s2722_s0 + $0xe0] sm:$0xff]  ;;  %v303_v2 = vld [vmem:[%s2722_s0 + $0xe8] sm:$0xff]  ;;  %v288_v3 = vld [vmem:[%s2722_s0 + $0x70] sm:$0xff] }
  0x26   : > { %342 = vperm.xlu0 %1858, %v338_v36   ;;  %599 = vmatpush.msra.mxu2 %v332_v37  ;;  %v286_v4 = vld [vmem:[%s2722_s0 + $0x60] sm:$0xff]  ;;  %v287_v5 = vld [vmem:[%s2722_s0 + $0x68] sm:$0xff] }
  0x27   : > { %623 = vmatpush.msra.mxu3 %v317_v38  ;;  %576 = vmatpush.msra.mxu1 %v331_v39  ;;  %v829_v39 = vlaneseq }
  0x28   : > { %600 = vmatpush.msra.mxu2 %v316_v41  ;;  %553 = vmatpush.msra.mxu0 %v330_v42 }
  0x29   : > { %1779 = vmatmul.msk.f32.vlgmr.msrb.gmra.mxu0 %vm350_vm0, %v2012_v17  ;;  %1781 = vmatmul.msk.f32.vlgmr.msrb.gmra.mxu1 %vm350_vm0, %v2012_v17  ;;  %vm2250_vm9 = vcmp.lt.s32.totalorder %v829_v39, 256 }
  0x2a   : > { %1783 = vmatmul.msk.f32.vlgmr.msrb.gmra.mxu2 %vm350_vm0, %v2012_v17  ;;  %1785 = vmatmul.msk.f32.vlgmr.msrb.gmra.mxu3 %vm350_vm0, %v2012_v17 }
  0x2b   : > { %624 = vmatpush.msra.mxu3 %v301_v43  ;;  %577 = vmatpush.msra.mxu1 %v315_v44 }
  0x2c   : > { %601 = vmatpush.msra.mxu2 %v300_v45  ;;  %554 = vmatpush.msra.mxu0 %v314_v46 }
  0x2d   : > { %625 = vmatpush.msra.mxu3 %v285_v47  ;;  %578 = vmatpush.msra.mxu1 %v299_v48 }
  0x2e   : > { %347 = vperm.xlu0 %1858, %v339_v49   ;;  %555 = vmatpush.msra.mxu0 %v298_v50 }
  0x2f   : > { %602 = vmatpush.msra.mxu2 %v284_v51  ;;  %579 = vmatpush.msra.mxu1 %v283_v52 }
  0x30   : > { %556 = vmatpush.msra.mxu0 %v282_v53  ;;  %714 = vmatpush.msrb.mxu3 %v337_v54 }
  0x31   : > { %1780 = vmatmul.msk.f32.gmra.mxu0 %vm350_vm0, %v2061_v30  ;;  %1782 = vmatmul.msk.f32.gmra.mxu1 %vm350_vm0, %v2061_v30 }
  0x32   : > { %1784 = vmatmul.msk.f32.gmra.mxu2 %vm350_vm0, %v2061_v30  ;;  %1786 = vmatmul.msk.f32.gmra.mxu3 %vm350_vm0, %v2061_v30 }
  0x33   : > { %691 = vmatpush.msrb.mxu2 %v336_v55  ;;  %715 = vmatpush.msrb.mxu3 %v321_v56 }
  0x34   : > { %668 = vmatpush.msrb.mxu1 %v335_v57  ;;  %645 = vmatpush.msrb.mxu0 %v334_v58 }
  0x35   : > { %692 = vmatpush.msrb.mxu2 %v320_v59  ;;  %716 = vmatpush.msrb.mxu3 %v305_v60 }
  0x36   : > { %669 = vmatpush.msrb.mxu1 %v319_v61  ;;  %646 = vmatpush.msrb.mxu0 %v318_v62 }
  0x37   : > { %693 = vmatpush.msrb.mxu2 %v304_v63  ;;  %717 = vmatpush.msrb.mxu3 %v289_v0 }
  0x38   : > { %647 = vmatpush.msrb.mxu0 %v302_v1  ;;  %670 = vmatpush.msrb.mxu1 %v303_v2 }
  0x39   : > { %1787 = vmatmul.msk.f32.vlgmr.msra.gmra.mxu0 %vm350_vm0, %v2012_v17  ;;  %1789 = vmatmul.msk.f32.vlgmr.msra.gmra.mxu1 %vm350_vm0, %v2012_v17 }
  0x3a   : > { %1791 = vmatmul.msk.f32.vlgmr.msra.gmra.mxu2 %vm350_vm0, %v2012_v17  ;;  %1793 = vmatmul.msk.f32.vlgmr.msra.gmra.mxu3 %vm350_vm0, %v2012_v17 }
  0x3b   : > { %694 = vmatpush.msrb.mxu2 %v288_v3  ;;  %648 = vmatpush.msrb.mxu0 %v286_v4 }
  0x3c   : > { %671 = vmatpush.msrb.mxu1 %v287_v5 }
  0x41   : > { %1788 = vmatmul.msk.f32.gmra.mxu0 %vm350_vm0, %v2061_v30  ;;  %1790 = vmatmul.msk.f32.gmra.mxu1 %vm350_vm0, %v2061_v30 }
  0x42   : > { %1792 = vmatmul.msk.f32.gmra.mxu2 %vm350_vm0, %v2061_v30  ;;  %1794 = vmatmul.msk.f32.gmra.mxu3 %vm350_vm0, %v2061_v30 }
  0x49   : > { %1795 = vmatmul.msk.f32.vlgmr.msrb.gmra.mxu0 %vm350_vm0, %v2012_v17  ;;  %1797 = vmatmul.msk.f32.vlgmr.msrb.gmra.mxu1 %vm350_vm0, %v2012_v17 }
  0x4a   : > { %1799 = vmatmul.msk.f32.vlgmr.msrb.gmra.mxu2 %vm350_vm0, %v2012_v17  ;;  %1801 = vmatmul.msk.f32.vlgmr.msrb.gmra.mxu3 %vm350_vm0, %v2012_v17 }
  0x51   : > { %1796 = vmatmul.msk.f32.gmra.mxu0 %vm350_vm0, %v2061_v30  ;;  %1798 = vmatmul.msk.f32.gmra.mxu1 %vm350_vm0, %v2061_v30 }
  0x52   : > { %1800 = vmatmul.msk.f32.gmra.mxu2 %vm350_vm0, %v2061_v30  ;;  %1802 = vmatmul.msk.f32.gmra.mxu3 %vm350_vm0, %v2061_v30 }
  0x96   : > { %v374_v6 = vpop.f32.mrf.mxu0  ;;  %v397_v7 = vpop.f32.mrf.mxu1 }
  0x98   : > { %v2233_v12 = vpop.permute.xlu0 %342 }
  0x99   : > { %v398_v17 = vadd.f32 %v397_v7, %v2233_v12  ;;  %v375_v21 = vadd.f32 %v374_v6, %v2233_v12 }
  0x9b   : > { %v726_v24 = vmax.f32 %v398_v17, 0.0  ;;  %v725_v34 = vmax.f32 %v375_v21, 0.0 }
  0x9d   : > { %v420_v8 = vpop.f32.mrf.mxu2  ;;  %v443_v9 = vpop.f32.mrf.mxu3 }
  0x9e   : > { %v377_v10 = vpop.f32.mrf.mxu0  ;;  %v400_v11 = vpop.f32.mrf.mxu1  ;;  %v444_v18 = vadd.f32 %v443_v9, %v2233_v12  ;;  %v421_v22 = vadd.f32 %v420_v8, %v2233_v12 }
  0xa0   : > { %v2241_v23 = vpop.permute.xlu0 %347  ;;  %v728_v25 = vmax.f32 %v444_v18, 0.0  ;;  %v727_v35 = vmax.f32 %v421_v22, 0.0 }
  0xa1   : > { %v401_v38 = vadd.f32 %v400_v11, %v2241_v23  ;;  %v378_v48 = vadd.f32 %v377_v10, %v2241_v23 }
  0xa2   : > { %v758_v40 = vmax.f32 %v726_v24, %v728_v25  ;;  %v757_v46 = vmax.f32 %v725_v34, %v727_v35 }
  0xa3   : > { %v742_v49 = vmax.f32 %v401_v38, 0.0  ;;  %v741_v11 = vmax.f32 %v378_v48, 0.0 }
  0xa5   : > { %v423_v13 = vpop.f32.mrf.mxu2  ;;  %v446_v14 = vpop.f32.mrf.mxu3 }
  0xa6   : > { %v466_v15 = vpop.f32.mrf.mxu0  ;;  %v489_v16 = vpop.f32.mrf.mxu1  ;;  %v447_v41 = vadd.f32 %v446_v14, %v2241_v23  ;;  %v424_v53 = vadd.f32 %v423_v13, %v2241_v23 }
  0xa7   : > { %v467_v19 = vadd.f32 %v466_v15, %v2233_v12  ;;  %v490_v20 = vadd.f32 %v489_v16, %v2233_v12 }
  0xa8   : > { %v744_v54 = vmax.f32 %v447_v41, 0.0  ;;  %v743_v13 = vmax.f32 %v424_v53, 0.0 }
  0xa9   : > { %v729_v28 = vmax.f32 %v467_v19, 0.0  ;;  %v730_v29 = vmax.f32 %v490_v20, 0.0 }
  0xaa   : > { %v760_v21 = vmax.f32 %v742_v49, %v744_v54 }
  0xad   : > { %v512_v26 = vpop.f32.mrf.mxu2  ;;  %v535_v27 = vpop.f32.mrf.mxu3 }
  0xae   : > { %v513_v30 = vadd.f32 %v512_v26, %v2233_v12  ;;  %v536_v31 = vadd.f32 %v535_v27, %v2233_v12  ;;  %v469_v32 = vpop.f32.mrf.mxu0  ;;  %v492_v33 = vpop.f32.mrf.mxu1  ;;  %v759_v27 = vmax.f32 %v741_v11, %v743_v13 }
  0xaf   : > { %v470_v44 = vadd.f32 %v469_v32, %v2241_v23  ;;  %v493_v45 = vadd.f32 %v492_v33, %v2241_v23 }
  0xb0   : > { %v731_v36 = vmax.f32 %v513_v30, 0.0  ;;  %v732_v37 = vmax.f32 %v536_v31, 0.0 }
  0xb1   : > { %v745_v59 = vmax.f32 %v470_v44, 0.0  ;;  %v746_v60 = vmax.f32 %v493_v45, 0.0 }
  0xb2   : > { %v761_v42 = vmax.f32 %v729_v28, %v731_v36  ;;  %v762_v43 = vmax.f32 %v730_v29, %v732_v37 }
  0xb4   : > { %v766_v47 = vmax.f32 %v758_v40, %v762_v43  ;;  %v765_v55 = vmax.f32 %v757_v46, %v761_v42 }
  0xb5   : > { %v515_v51 = vpop.f32.mrf.mxu2  ;;  %v538_v52 = vpop.f32.mrf.mxu3 }
  0xb6   : > { %v773_v56 = vrot.slane %v766_v47, 7  ;;  %v2255_v57 = vpop.f32.mrf.mxu0  ;;  %v2257_v58 = vpop.f32.mrf.mxu1  ;;  %v516_v61 = vadd.f32 %v515_v51, %v2241_v23  ;;  %v539_v62 = vadd.f32 %v538_v52, %v2241_v23 }
  0xb7   : > { %v582_v48 = vadd.f32 %v2257_v58, %v2233_v12 }
  0xb8   : > { %v776_v63 = vsel %vm775_vm1, %v765_v55, %v773_v56  ;;  %v778_v0 = vsel %vm777_vm2, %v765_v55, %v773_v56  ;;  %v781_v1 = vsel %vm780_vm3, %v765_v55, %v773_v56  ;;  %v784_v2 = vsel %vm783_vm4, %v765_v55, %v773_v56 }
  0xb9   : > { %v779_v3 = vrot.slane %v778_v0, 1  ;;  %v782_v4 = vrot.slane %v781_v1, 2  ;;  %v785_v5 = vrot.slane %v784_v2, 3  ;;  %v787_v6 = vsel %vm786_vm5, %v765_v55, %v773_v56  ;;  %833 = vst.msk [vmem:[#allocation2] ss:$2 sm:$0x3] %vm2250_vm9, %v776_v63 }
  0xba   : > { %v788_v7 = vrot.slane %v787_v6, 4  ;;  %v790_v8 = vsel %vm789_vm6, %v765_v55, %v773_v56  ;;  %v793_v9 = vsel %vm792_vm7, %v765_v55, %v773_v56  ;;  %v796_v10 = vsel %vm795_vm8, %v773_v56, %v765_v55 }
  0xbb   : > { %v791_v14 = vrot.slane %v790_v8, 5  ;;  %835 = vst.msk [vmem:[#allocation2 + $0x4] ss:$2 sm:$0x3] %vm2250_vm9, %v779_v3  ;;  %v794_v15 = vrot.slane %v793_v9, 6  ;;  %v747_v16 = vmax.f32 %v516_v61, 0.0  ;;  %v559_v55 = vadd.f32 %v2255_v57, %v2233_v12 }
  0xbc   : > { %837 = vst.msk [vmem:[#allocation2 + $0x8] ss:$2 sm:$0x3] %vm2250_vm9, %v782_v4  ;;  %v748_v17 = vmax.f32 %v539_v62, 0.0  ;;  %v797_v18 = vrot.slane %v796_v10, 7  ;;  %v734_v58 = vmax.f32 %v582_v48, 0.0 }
  0xbd   : > { %839 = vst.msk [vmem:[#allocation2 + $0xc] ss:$2 sm:$0x3] %vm2250_vm9, %v785_v5  ;;  %v604_v19 = vpop.f32.mrf.mxu2  ;;  %v627_v20 = vpop.f32.mrf.mxu3  ;;  %v763_v22 = vmax.f32 %v745_v59, %v747_v16  ;;  %v733_v2 = vmax.f32 %v559_v55, 0.0 }
  0xbe   : > { %841 = vst.msk [vmem:[#allocation2 + $0x10] ss:$2 sm:$0x3] %vm2250_vm9, %v788_v7  ;;  %v764_v24 = vmax.f32 %v746_v60, %v748_v17  ;;  %v561_v25 = vpop.f32.mrf.mxu0  ;;  %v584_v26 = vpop.f32.mrf.mxu1  ;;  %v628_v49 = vadd.f32 %v627_v20, %v2233_v12  ;;  %v605_v56 = vadd.f32 %v604_v19, %v2233_v12 }
  0xbf   : > { %843 = vst.msk [vmem:[#allocation2 + $0x14] ss:$2 sm:$0x3] %vm2250_vm9, %v791_v14  ;;  %v767_v29 = vmax.f32 %v759_v27, %v763_v22  ;;  %v562_v6 = vadd.f32 %v561_v25, %v2241_v23  ;;  %v585_v7 = vadd.f32 %v584_v26, %v2241_v23 }
  0xc0   : > { %845 = vst.msk [vmem:[#allocation2 + $0x18] ss:$2 sm:$0x3] %vm2250_vm9, %v794_v15  ;;  %v768_v28 = vmax.f32 %v760_v21, %v764_v24  ;;  %v736_v59 = vmax.f32 %v628_v49, 0.0  ;;  %v735_v3 = vmax.f32 %v605_v56, 0.0 }
  0xc1   : > { %847 = vst.msk [vmem:[#allocation2 + $0x1c] ss:$2 sm:$0x3] %vm2250_vm9, %v797_v18  ;;  %v750_v17 = vmax.f32 %v585_v7, 0.0 }
  0xc2   : > { %v774_v30 = vrot.slane %v768_v28, 7  ;;  %v865_v57 = vmax.f32 %v734_v58, %v736_v59  ;;  %v864_v13 = vmax.f32 %v733_v2, %v735_v3 }
  0xc4   : > { %v798_v31 = vsel %vm775_vm1, %v767_v29, %v774_v30  ;;  %v799_v32 = vsel %vm777_vm2, %v767_v29, %v774_v30  ;;  %v801_v33 = vsel %vm780_vm3, %v767_v29, %v774_v30  ;;  %v803_v34 = vsel %vm783_vm4, %v767_v29, %v774_v30 }
  0xc5   : > { %v800_v35 = vrot.slane %v799_v32, 1  ;;  %v802_v36 = vrot.slane %v801_v33, 2  ;;  %v804_v37 = vrot.slane %v803_v34, 3  ;;  %v805_v38 = vsel %vm786_vm5, %v767_v29, %v774_v30  ;;  %849 = vst.msk [vmem:[#allocation2 + $0x20] ss:$2 sm:$0x3] %vm2250_vm9, %v798_v31  ;;  %v607_v39 = vpop.f32.mrf.mxu2  ;;  %v630_v40 = vpop.f32.mrf.mxu3 }
  0xc6   : > { %v806_v41 = vrot.slane %v805_v38, 4  ;;  %v807_v42 = vsel %vm789_vm6, %v767_v29, %v774_v30  ;;  %v809_v43 = vsel %vm792_vm7, %v767_v29, %v774_v30  ;;  %v811_v44 = vsel %vm795_vm8, %v774_v30, %v767_v29  ;;  %v650_v51 = vpop.f32.mrf.mxu0  ;;  %v673_v52 = vpop.f32.mrf.mxu1 }
  0xc7   : > { %v808_v45 = vrot.slane %v807_v42, 5  ;;  %851 = vst.msk [vmem:[#allocation2 + $0x24] ss:$2 sm:$0x3] %vm2250_vm9, %v800_v35  ;;  %v810_v46 = vrot.slane %v809_v43, 6  ;;  %v812_v47 = vrot.slane %v811_v44, 7  ;;  %v651_v53 = vadd.f32 %v650_v51, %v2233_v12 }
  0xc8   : > { %853 = vst.msk [vmem:[#allocation2 + $0x28] ss:$2 sm:$0x3] %vm2250_vm9, %v802_v36  ;;  %v674_v54 = vadd.f32 %v673_v52, %v2233_v12  ;;  %v608_v8 = vadd.f32 %v607_v39, %v2241_v23  ;;  %v631_v9 = vadd.f32 %v630_v40, %v2241_v23 }
  0xc9   : > { %855 = vst.msk [vmem:[#allocation2 + $0x2c] ss:$2 sm:$0x3] %vm2250_vm9, %v804_v37  ;;  %v737_v62 = vmax.f32 %v651_v53, 0.0 }
  0xca   : > { %857 = vst.msk [vmem:[#allocation2 + $0x30] ss:$2 sm:$0x3] %vm2250_vm9, %v806_v41  ;;  %v738_v63 = vmax.f32 %v674_v54, 0.0  ;;  %v751_v20 = vmax.f32 %v608_v8, 0.0  ;;  %v752_v21 = vmax.f32 %v631_v9, 0.0 }
  0xcb   : > { %859 = vst.msk [vmem:[#allocation2 + $0x34] ss:$2 sm:$0x3] %vm2250_vm9, %v808_v45 }
  0xcc   : > { %861 = vst.msk [vmem:[#allocation2 + $0x38] ss:$2 sm:$0x3] %vm2250_vm9, %v810_v46 }
  0xcd   : > { %863 = vst.msk [vmem:[#allocation2 + $0x3c] ss:$2 sm:$0x3] %vm2250_vm9, %v812_v47  ;;  %v696_v60 = vpop.f32.mrf.mxu2  ;;  %v719_v61 = vpop.f32.mrf.mxu3  ;;  %v867_v47 = vmax.f32 %v750_v17, %v752_v21 }
  0xce   : > { %v697_v0 = vadd.f32 %v696_v60, %v2233_v12  ;;  %v720_v1 = vadd.f32 %v719_v61, %v2233_v12  ;;  %v653_v15 = vpop.f32.mrf.mxu0  ;;  %v676_v16 = vpop.f32.mrf.mxu1  ;;  %v749_v12 = vmax.f32 %v562_v6, 0.0 }
  0xcf   : > { %v654_v25 = vadd.f32 %v653_v15, %v2241_v23  ;;  %v677_v26 = vadd.f32 %v676_v16, %v2241_v23 }
  0xd0   : > { %v739_v4 = vmax.f32 %v697_v0, 0.0  ;;  %v740_v5 = vmax.f32 %v720_v1, 0.0  ;;  %v866_v51 = vmax.f32 %v749_v12, %v751_v20 }
  0xd1   : > { %v753_v41 = vmax.f32 %v654_v25, 0.0  ;;  %v754_v42 = vmax.f32 %v677_v26, 0.0 }
  0xd2   : > { %v868_v10 = vmax.f32 %v737_v62, %v739_v4  ;;  %v869_v11 = vmax.f32 %v738_v63, %v740_v5 }
  0xd4   : > { %v873_v14 = vmax.f32 %v865_v57, %v869_v11  ;;  %v872_v22 = vmax.f32 %v864_v13, %v868_v10 }
  0xd5   : > { %v699_v18 = vpop.f32.mrf.mxu2  ;;  %v722_v19 = vpop.f32.mrf.mxu3 }
  0xd6   : > { %v880_v24 = vrot.slane %v873_v14, 7  ;;  %v700_v27 = vadd.f32 %v699_v18, %v2241_v23  ;;  %v723_v28 = vadd.f32 %v722_v19, %v2241_v23 }
  0xd8   : > { %v882_v29 = vsel %vm775_vm1, %v872_v22, %v880_v24  ;;  %v883_v30 = vsel %vm777_vm2, %v872_v22, %v880_v24  ;;  %v885_v31 = vsel %vm780_vm3, %v872_v22, %v880_v24  ;;  %v887_v32 = vsel %vm783_vm4, %v872_v22, %v880_v24 }
  0xd9   : > { %v884_v33 = vrot.slane %v883_v30, 1  ;;  %v886_v34 = vrot.slane %v885_v31, 2  ;;  %v888_v35 = vrot.slane %v887_v32, 3  ;;  %v889_v36 = vsel %vm786_vm5, %v872_v22, %v880_v24  ;;  %929 = vst.msk [vmem:[#allocation2 + $0x1] ss:$2 sm:$0x3] %vm2250_vm9, %v882_v29 }
  0xda   : > { %v890_v37 = vrot.slane %v889_v36, 4  ;;  %v891_v38 = vsel %vm789_vm6, %v872_v22, %v880_v24  ;;  %v893_v23 = vsel %vm792_vm7, %v872_v22, %v880_v24  ;;  %v895_v39 = vsel %vm795_vm8, %v880_v24, %v872_v22 }
  0xdb   : > { %v892_v40 = vrot.slane %v891_v38, 5  ;;  %931 = vst.msk [vmem:[#allocation2 + $0x5] ss:$2 sm:$0x3] %vm2250_vm9, %v884_v33  ;;  %v894_v43 = vrot.slane %v893_v23, 6  ;;  %v755_v44 = vmax.f32 %v700_v27, 0.0 }
  0xdc   : > { %933 = vst.msk [vmem:[#allocation2 + $0x9] ss:$2 sm:$0x3] %vm2250_vm9, %v886_v34  ;;  %v756_v45 = vmax.f32 %v723_v28, 0.0  ;;  %v896_v46 = vrot.slane %v895_v39, 7 }
  0xdd   : > { %935 = vst.msk [vmem:[#allocation2 + $0xd] ss:$2 sm:$0x3] %vm2250_vm9, %v888_v35  ;;  %v870_v48 = vmax.f32 %v753_v41, %v755_v44 }
  0xde   : > { %937 = vst.msk [vmem:[#allocation2 + $0x11] ss:$2 sm:$0x3] %vm2250_vm9, %v890_v37  ;;  %v871_v49 = vmax.f32 %v754_v42, %v756_v45 }
  0xdf   : > { %939 = vst.msk [vmem:[#allocation2 + $0x15] ss:$2 sm:$0x3] %vm2250_vm9, %v892_v40  ;;  %v874_v53 = vmax.f32 %v866_v51, %v870_v48 }
  0xe0   : > { %941 = vst.msk [vmem:[#allocation2 + $0x19] ss:$2 sm:$0x3] %vm2250_vm9, %v894_v43  ;;  %v875_v52 = vmax.f32 %v867_v47, %v871_v49 }
  0xe1   : > { %943 = vst.msk [vmem:[#allocation2 + $0x1d] ss:$2 sm:$0x3] %vm2250_vm9, %v896_v46 }
  0xe2   : > { %v881_v54 = vrot.slane %v875_v52, 7 }
  0xe4   : > { %v897_v55 = vsel %vm775_vm1, %v874_v53, %v881_v54  ;;  %v898_v56 = vsel %vm777_vm2, %v874_v53, %v881_v54  ;;  %v900_v58 = vsel %vm780_vm3, %v874_v53, %v881_v54  ;;  %v902_v59 = vsel %vm783_vm4, %v874_v53, %v881_v54 }
  0xe5   : > { %v899_v60 = vrot.slane %v898_v56, 1  ;;  %v901_v61 = vrot.slane %v900_v58, 2  ;;  %v903_v62 = vrot.slane %v902_v59, 3  ;;  %v904_v63 = vsel %vm786_vm5, %v874_v53, %v881_v54  ;;  %945 = vst.msk [vmem:[#allocation2 + $0x21] ss:$2 sm:$0x3] %vm2250_vm9, %v897_v55 }
  0xe6   : > { %v905_v0 = vrot.slane %v904_v63, 4  ;;  %v906_v1 = vsel %vm789_vm6, %v874_v53, %v881_v54  ;;  %v908_v2 = vsel %vm792_vm7, %v874_v53, %v881_v54  ;;  %v910_v3 = vsel %vm795_vm8, %v881_v54, %v874_v53 }
  0xe7   : > { %v907_v4 = vrot.slane %v906_v1, 5  ;;  %947 = vst.msk [vmem:[#allocation2 + $0x25] ss:$2 sm:$0x3] %vm2250_vm9, %v899_v60  ;;  %v909_v5 = vrot.slane %v908_v2, 6  ;;  %v911_v57 = vrot.slane %v910_v3, 7 }
  0xe8   : > { %949 = vst.msk [vmem:[#allocation2 + $0x29] ss:$2 sm:$0x3] %vm2250_vm9, %v901_v61 }
  0xe9   : > { %951 = vst.msk [vmem:[#allocation2 + $0x2d] ss:$2 sm:$0x3] %vm2250_vm9, %v903_v62 }
  0xea   : > { %953 = vst.msk [vmem:[#allocation2 + $0x31] ss:$2 sm:$0x3] %vm2250_vm9, %v905_v0 }
  0xeb   : > { %955 = vst.msk [vmem:[#allocation2 + $0x35] ss:$2 sm:$0x3] %vm2250_vm9, %v907_v4 }
  0xec   : > { %957 = vst.msk [vmem:[#allocation2 + $0x39] ss:$2 sm:$0x3] %vm2250_vm9, %v909_v5 }
  0xed   : > { %959 = vst.msk [vmem:[#allocation2 + $0x3d] ss:$2 sm:$0x3] %vm2250_vm9, %v911_v57 }
  0xee PF: > { %v1017_v6 = vld [vmem:[%s1958_s30 + $0x178] sm:$0xff]  ;;  %v1016_v9 = vld [vmem:[%s1958_s30 + $0x170] sm:$0xff]  ;;  %v1015_v14 = vld [vmem:[%s1958_s30 + $0x168] sm:$0xff]  ;;  %s1833_s26 = sshll.u32 %s1950_s25, 5  ;;  %p1827_p5 = scmp.ne.s32.totalorder %s1950_s25, 1 }
  0xef   : > { %v1033_v7 = vld [vmem:[%s1958_s30 + $0x1f8] sm:$0xff]  ;;  %1040 = vmatpush.msra.mxu0 %v1017_v6  ;;  %v1032_v10 = vld [vmem:[%s1958_s30 + $0x1f0] sm:$0xff]  ;;  %v1031_v15 = vld [vmem:[%s1958_s30 + $0x1e8] sm:$0xff]  ;;  %s2460_s27 = scalar_lea.vmem [#allocation2], %s1833_s26 }
  0xf0   : > { %v980_v8 = vld [vmem:[%s1958_s30 + $0x78] sm:$0xff]  ;;  %1060 = vmatpush.msra.mxu1 %v1033_v7  ;;  %v979_v11 = vld [vmem:[%s1958_s30 + $0x70] sm:$0xff]  ;;  %v978_v16 = vld [vmem:[%s1958_s30 + $0x68] sm:$0xff] }
  0xf1   : > { %v996_v50 = vld [vmem:[%s1958_s30 + $0xf8] sm:$0xff]  ;;  %1086 = vmatpush.msra.mxu2 %v980_v8  ;;  %v995_v13 = vld [vmem:[%s1958_s30 + $0xf0] sm:$0xff]  ;;  %1041 = vmatpush.msra.mxu0 %v1016_v9  ;;  %v994_v12 = vld [vmem:[%s1958_s30 + $0xe8] sm:$0xff] }
  0xf2   : > { %1106 = vmatpush.msra.mxu3 %v996_v50  ;;  %1061 = vmatpush.msra.mxu1 %v1032_v10  ;;  %v1014_v17 = vld [vmem:[%s1958_s30 + $0x160] sm:$0xff]  ;;  %v1013_v21 = vld [vmem:[%s1958_s30 + $0x158] sm:$0xff]  ;;  %v1012_v26 = vld [vmem:[%s1958_s30 + $0x150] sm:$0xff] }
  0xf3   : > { %1087 = vmatpush.msra.mxu2 %v979_v11  ;;  %v1030_v18 = vld [vmem:[%s1958_s30 + $0x1e0] sm:$0xff]  ;;  %1042 = vmatpush.msra.mxu0 %v1015_v14  ;;  %v1029_v22 = vld [vmem:[%s1958_s30 + $0x1d8] sm:$0xff]  ;;  %v1028_v27 = vld [vmem:[%s1958_s30 + $0x1d0] sm:$0xff] }
  0xf4   : > { %1107 = vmatpush.msra.mxu3 %v995_v13  ;;  %1062 = vmatpush.msra.mxu1 %v1031_v15  ;;  %v977_v19 = vld [vmem:[%s1958_s30 + $0x60] sm:$0xff]  ;;  %v976_v24 = vld [vmem:[%s1958_s30 + $0x58] sm:$0xff]  ;;  %v975_v28 = vld [vmem:[%s1958_s30 + $0x50] sm:$0xff] }
  0xf5   : > { %v993_v20 = vld [vmem:[%s1958_s30 + $0xe0] sm:$0xff]  ;;  %1088 = vmatpush.msra.mxu2 %v978_v16  ;;  %1043 = vmatpush.msra.mxu0 %v1014_v17  ;;  %v992_v25 = vld [vmem:[%s1958_s30 + $0xd8] sm:$0xff]  ;;  %v991_v29 = vld [vmem:[%s1958_s30 + $0xd0] sm:$0xff] }
  0xf6   : > { %1108 = vmatpush.msra.mxu3 %v994_v12  ;;  %1063 = vmatpush.msra.mxu1 %v1030_v18  ;;  %v1011_v30 = vld [vmem:[%s1958_s30 + $0x148] sm:$0xff]  ;;  %v1010_v34 = vld [vmem:[%s1958_s30 + $0x140] sm:$0xff]  ;;  %v1009_v38 = vld [vmem:[%s1958_s30 + $0x138] sm:$0xff] }
  0xf7   : > { %1089 = vmatpush.msra.mxu2 %v977_v19  ;;  %1044 = vmatpush.msra.mxu0 %v1013_v21  ;;  %v1027_v31 = vld [vmem:[%s1958_s30 + $0x1c8] sm:$0xff]  ;;  %v1026_v35 = vld [vmem:[%s1958_s30 + $0x1c0] sm:$0xff]  ;;  %v1025_v23 = vld [vmem:[%s1958_s30 + $0x1b8] sm:$0xff] }
  0xf8   : > { %1109 = vmatpush.msra.mxu3 %v993_v20  ;;  %1064 = vmatpush.msra.mxu1 %v1029_v22  ;;  %v974_v32 = vld [vmem:[%s1958_s30 + $0x48] sm:$0xff]  ;;  %v973_v36 = vld [vmem:[%s1958_s30 + $0x40] sm:$0xff]  ;;  %v972_v39 = vld [vmem:[%s1958_s30 + $0x38] sm:$0xff] }
  0xf9   : > { %1090 = vmatpush.msra.mxu2 %v976_v24  ;;  %1045 = vmatpush.msra.mxu0 %v1012_v26  ;;  %v990_v33 = vld [vmem:[%s1958_s30 + $0xc8] sm:$0xff]  ;;  %v989_v37 = vld [vmem:[%s1958_s30 + $0xc0] sm:$0xff]  ;;  %v988_v40 = vld [vmem:[%s1958_s30 + $0xb8] sm:$0xff] }
  0xfa   : > { %1110 = vmatpush.msra.mxu3 %v992_v25  ;;  %1065 = vmatpush.msra.mxu1 %v1028_v27  ;;  %v1008_v41 = vld [vmem:[%s1958_s30 + $0x130] sm:$0xff]  ;;  %v1007_v45 = vld [vmem:[%s1958_s30 + $0x128] sm:$0xff]  ;;  %v1006_v49 = vld [vmem:[%s1958_s30 + $0x120] sm:$0xff] }
  0xfb   : > { %1091 = vmatpush.msra.mxu2 %v975_v28  ;;  %1046 = vmatpush.msra.mxu0 %v1011_v30  ;;  %v1024_v42 = vld [vmem:[%s1958_s30 + $0x1b0] sm:$0xff]  ;;  %v1023_v46 = vld [vmem:[%s1958_s30 + $0x1a8] sm:$0xff]  ;;  %v1022_v51 = vld [vmem:[%s1958_s30 + $0x1a0] sm:$0xff] }
  0xfc   : > { %1111 = vmatpush.msra.mxu3 %v991_v29  ;;  %1066 = vmatpush.msra.mxu1 %v1027_v31  ;;  %v971_v43 = vld [vmem:[%s1958_s30 + $0x30] sm:$0xff]  ;;  %v970_v47 = vld [vmem:[%s1958_s30 + $0x28] sm:$0xff]  ;;  %v969_v52 = vld [vmem:[%s1958_s30 + $0x20] sm:$0xff] }
  0xfd   : > { %1092 = vmatpush.msra.mxu2 %v974_v32  ;;  %1047 = vmatpush.msra.mxu0 %v1010_v34  ;;  %v987_v44 = vld [vmem:[%s1958_s30 + $0xb0] sm:$0xff]  ;;  %v986_v48 = vld [vmem:[%s1958_s30 + $0xa8] sm:$0xff]  ;;  %v985_v53 = vld [vmem:[%s1958_s30 + $0xa0] sm:$0xff] }
  0xfe   : > { %1112 = vmatpush.msra.mxu3 %v990_v33  ;;  %1067 = vmatpush.msra.mxu1 %v1026_v35  ;;  %v1005_v54 = vld [vmem:[%s1958_s30 + $0x118] sm:$0xff]  ;;  %v1004_v59 = vld [vmem:[%s1958_s30 + $0x110] sm:$0xff]  ;;  %v1003_v63 = vld [vmem:[%s1958_s30 + $0x108] sm:$0xff] }
  0xff   : > { %1093 = vmatpush.msra.mxu2 %v973_v36  ;;  %1048 = vmatpush.msra.mxu0 %v1009_v38  ;;  %v1021_v55 = vld [vmem:[%s1958_s30 + $0x198] sm:$0xff]  ;;  %v1020_v60 = vld [vmem:[%s1958_s30 + $0x190] sm:$0xff]  ;;  %v1019_v0 = vld [vmem:[%s1958_s30 + $0x188] sm:$0xff] }
 0x100   : > { %1113 = vmatpush.msra.mxu3 %v989_v37  ;;  %1068 = vmatpush.msra.mxu1 %v1025_v23  ;;  %v968_v56 = vld [vmem:[%s1958_s30 + $0x18] sm:$0xff]  ;;  %v967_v61 = vld [vmem:[%s1958_s30 + $0x10] sm:$0xff]  ;;  %v966_v1 = vld [vmem:[%s1958_s30 + $0x8] sm:$0xff] }
 0x101   : > { %1094 = vmatpush.msra.mxu2 %v972_v39  ;;  %1049 = vmatpush.msra.mxu0 %v1008_v41  ;;  %v984_v58 = vld [vmem:[%s1958_s30 + $0x98] sm:$0xff]  ;;  %v983_v62 = vld [vmem:[%s1958_s30 + $0x90] sm:$0xff]  ;;  %v982_v2 = vld [vmem:[%s1958_s30 + $0x88] sm:$0xff] }
 0x102   : > { %1114 = vmatpush.msra.mxu3 %v988_v40  ;;  %1069 = vmatpush.msra.mxu1 %v1024_v42  ;;  %v1002_v3 = vld [vmem:[%s1958_s30 + $0x100] sm:$0xff]  ;;  %v1146_v6 = vld [vmem:[%s1958_s30 + $0x278] sm:$0xff]  ;;  %v1145_v9 = vld [vmem:[%s1958_s30 + $0x270] sm:$0xff] }
 0x103   : > { %1095 = vmatpush.msra.mxu2 %v971_v43  ;;  %1050 = vmatpush.msra.mxu0 %v1007_v45  ;;  %v1018_v4 = vld [vmem:[%s1958_s30 + $0x180] sm:$0xff]  ;;  %v1162_v7 = vld [vmem:[%s1958_s30 + $0x2f8] sm:$0xff]  ;;  %v1161_v10 = vld [vmem:[%s1958_s30 + $0x2f0] sm:$0xff] }
 0x104   : > { %1115 = vmatpush.msra.mxu3 %v987_v44  ;;  %1070 = vmatpush.msra.mxu1 %v1023_v46  ;;  %v965_v5 = vld [vmem:[%s1958_s30] sm:$0xff]  ;;  %v1230_v8 = vld [vmem:[%s1958_s30 + $0x378] sm:$0xff]  ;;  %v1229_v11 = vld [vmem:[%s1958_s30 + $0x370] sm:$0xff] }
 0x105   : > { %1096 = vmatpush.msra.mxu2 %v970_v47  ;;  %1051 = vmatpush.msra.mxu0 %v1006_v49  ;;  %v981_v57 = vld [vmem:[%s1958_s30 + $0x80] sm:$0xff]  ;;  %v1246_v50 = vld [vmem:[%s1958_s30 + $0x3f8] sm:$0xff]  ;;  %v1245_v13 = vld [vmem:[%s1958_s30 + $0x3f0] sm:$0xff] }
 0x106   : > { %1116 = vmatpush.msra.mxu3 %v986_v48  ;;  %1071 = vmatpush.msra.mxu1 %v1022_v51  ;;  %v1144_v14 = vld [vmem:[%s1958_s30 + $0x268] sm:$0xff]  ;;  %v1143_v17 = vld [vmem:[%s1958_s30 + $0x260] sm:$0xff]  ;;  %v1142_v21 = vld [vmem:[%s1958_s30 + $0x258] sm:$0xff] }
 0x107   : > { %1097 = vmatpush.msra.mxu2 %v969_v52  ;;  %1052 = vmatpush.msra.mxu0 %v1005_v54  ;;  %v1160_v15 = vld [vmem:[%s1958_s30 + $0x2e8] sm:$0xff]  ;;  %v1159_v18 = vld [vmem:[%s1958_s30 + $0x2e0] sm:$0xff]  ;;  %v1158_v22 = vld [vmem:[%s1958_s30 + $0x2d8] sm:$0xff] }
 0x108   : > { %1117 = vmatpush.msra.mxu3 %v985_v53  ;;  %1072 = vmatpush.msra.mxu1 %v1021_v55  ;;  %v1228_v16 = vld [vmem:[%s1958_s30 + $0x368] sm:$0xff]  ;;  %v1227_v19 = vld [vmem:[%s1958_s30 + $0x360] sm:$0xff]  ;;  %v1226_v24 = vld [vmem:[%s1958_s30 + $0x358] sm:$0xff] }
 0x109   : > { %1098 = vmatpush.msra.mxu2 %v968_v56  ;;  %1053 = vmatpush.msra.mxu0 %v1004_v59  ;;  %v1244_v12 = vld [vmem:[%s1958_s30 + $0x3e8] sm:$0xff]  ;;  %v1243_v20 = vld [vmem:[%s1958_s30 + $0x3e0] sm:$0xff]  ;;  %v1242_v25 = vld [vmem:[%s1958_s30 + $0x3d8] sm:$0xff] }
 0x10a   : > { %1118 = vmatpush.msra.mxu3 %v984_v58  ;;  %1073 = vmatpush.msra.mxu1 %v1020_v60  ;;  %v1808_v26 = vld [vmem:[%s2460_s27 + $0x4] sm:$0xf]  ;;  %v1141_v27 = vld [vmem:[%s1958_s30 + $0x250] sm:$0xff]  ;;  %v1140_v31 = vld [vmem:[%s1958_s30 + $0x248] sm:$0xff] }
 0x10b   : > { %1099 = vmatpush.msra.mxu2 %v967_v61  ;;  %1054 = vmatpush.msra.mxu0 %v1003_v63  ;;  %v1157_v28 = vld [vmem:[%s1958_s30 + $0x2d0] sm:$0xff]  ;;  %1035 = vst [vmem:[#allocation1] ss:$4 sm:$0xff] %v1808_v26  ;;  %v1156_v32 = vld [vmem:[%s1958_s30 + $0x2c8] sm:$0xff]  ;;  %v1139_v35 = vld [vmem:[%s1958_s30 + $0x240] sm:$0xff] }
 0x10c   : > { %1119 = vmatpush.msra.mxu3 %v983_v62  ;;  %1074 = vmatpush.msra.mxu1 %v1019_v0  ;;  %v1225_v29 = vld [vmem:[%s1958_s30 + $0x350] sm:$0xff]  ;;  %v1224_v33 = vld [vmem:[%s1958_s30 + $0x348] sm:$0xff]  ;;  %v1155_v36 = vld [vmem:[%s1958_s30 + $0x2c0] sm:$0xff] }
 0x10d   : > { %1100 = vmatpush.msra.mxu2 %v966_v1  ;;  %1055 = vmatpush.msra.mxu0 %v1002_v3  ;;  %v1241_v30 = vld [vmem:[%s1958_s30 + $0x3d0] sm:$0xff]  ;;  %v1240_v34 = vld [vmem:[%s1958_s30 + $0x3c8] sm:$0xff]  ;;  %v1223_v37 = vld [vmem:[%s1958_s30 + $0x340] sm:$0xff] }
 0x10e   : > { %1120 = vmatpush.msra.mxu3 %v982_v2  ;;  %1075 = vmatpush.msra.mxu1 %v1018_v4  ;;  %v1239_v38 = vld [vmem:[%s1958_s30 + $0x3c0] sm:$0xff]  ;;  %v1138_v23 = vld [vmem:[%s1958_s30 + $0x238] sm:$0xff]  ;;  %v1137_v45 = vld [vmem:[%s1958_s30 + $0x230] sm:$0xff] }
 0x10f   : > { %1101 = vmatpush.msra.mxu2 %v965_v5  ;;  %1169 = vmatpush.msrb.mxu0 %v1146_v6  ;;  %v964_v39 = vld [vmem:[%s2460_s27] sm:$0xf]  ;;  %v1154_v40 = vld [vmem:[%s1958_s30 + $0x2b8] sm:$0xff]  ;;  %v1153_v46 = vld [vmem:[%s1958_s30 + $0x2b0] sm:$0xff] }
 0x110   : > { %1121 = vmatpush.msra.mxu3 %v981_v57  ;;  %1189 = vmatpush.msrb.mxu1 %v1162_v7  ;;  %v1222_v41 = vld [vmem:[%s1958_s30 + $0x338] sm:$0xff]  ;;  %v1221_v47 = vld [vmem:[%s1958_s30 + $0x330] sm:$0xff]  ;;  %v1136_v49 = vld [vmem:[%s1958_s30 + $0x228] sm:$0xff] }
 0x111   : > { %1253 = vmatpush.msrb.mxu2 %v1230_v8  ;;  %1170 = vmatpush.msrb.mxu0 %v1145_v9  ;;  %v1238_v42 = vld [vmem:[%s1958_s30 + $0x3b8] sm:$0xff]  ;;  %v1237_v48 = vld [vmem:[%s1958_s30 + $0x3b0] sm:$0xff]  ;;  %v1152_v51 = vld [vmem:[%s1958_s30 + $0x2a8] sm:$0xff] }
 0x112   : > { %1273 = vmatpush.msrb.mxu3 %v1246_v50  ;;  %1190 = vmatpush.msrb.mxu1 %v1161_v10  ;;  %v2480_v43 = vld.sshfl [vmem:[#allocation1] sm:$0xff pattern:$0x73625140]  ;;  %v2482_v44 = vld.sshfl [vmem:[#allocation1 + $0x8] sm:$0xff pattern:$0x73625140] }
 0x113   : > { %1254 = vmatpush.msrb.mxu2 %v1229_v11  ;;  %1171 = vmatpush.msrb.mxu0 %v1144_v14  ;;  %1081 = vst [vmem:[#allocation1] ss:$4 sm:$0xff] %v964_v39  ;;  %v1220_v52 = vld [vmem:[%s1958_s30 + $0x328] sm:$0xff]  ;;  %v1135_v54 = vld [vmem:[%s1958_s30 + $0x220] sm:$0xff]  ;;  %v1134_v59 = vld [vmem:[%s1958_s30 + $0x218] sm:$0xff] }
 0x114   : > { %1274 = vmatpush.msrb.mxu3 %v1245_v13  ;;  %1191 = vmatpush.msrb.mxu1 %v1160_v15  ;;  %v1236_v53 = vld [vmem:[%s1958_s30 + $0x3a8] sm:$0xff]  ;;  %v1151_v55 = vld [vmem:[%s1958_s30 + $0x2a0] sm:$0xff]  ;;  %v1150_v61 = vld [vmem:[%s1958_s30 + $0x298] sm:$0xff] }
 0x115   : > { %1255 = vmatpush.msrb.mxu2 %v1228_v16  ;;  %1172 = vmatpush.msrb.mxu0 %v1143_v17  ;;  %v1219_v56 = vld [vmem:[%s1958_s30 + $0x320] sm:$0xff]  ;;  %v1811_v60 = vld [vmem:[%s2460_s27 + $0x8] sm:$0xf]  ;;  %v1218_v62 = vld [vmem:[%s1958_s30 + $0x318] sm:$0xff] }
 0x116   : > { %1275 = vmatpush.msrb.mxu3 %v1244_v12  ;;  %1192 = vmatpush.msrb.mxu1 %v1159_v18  ;;  %v1235_v58 = vld [vmem:[%s1958_s30 + $0x3a0] sm:$0xff]  ;;  %v1234_v63 = vld [vmem:[%s1958_s30 + $0x398] sm:$0xff]  ;;  %v1133_v2 = vld [vmem:[%s1958_s30 + $0x210] sm:$0xff] }
 0x117   : > { %1256 = vmatpush.msrb.mxu2 %v1227_v19  ;;  %1173 = vmatpush.msrb.mxu0 %v1142_v21  ;;  %v1149_v3 = vld [vmem:[%s1958_s30 + $0x290] sm:$0xff]  ;;  %v1132_v57 = vld [vmem:[%s1958_s30 + $0x208] sm:$0xff]  ;;  %v1131_v9 = vld [vmem:[%s1958_s30 + $0x200] sm:$0xff] }
 0x118   : > { %1276 = vmatpush.msrb.mxu3 %v1243_v20  ;;  %1193 = vmatpush.msrb.mxu1 %v1158_v22  ;;  %v1217_v4 = vld [vmem:[%s1958_s30 + $0x310] sm:$0xff]  ;;  %v1148_v6 = vld [vmem:[%s1958_s30 + $0x288] sm:$0xff]  ;;  %v1147_v10 = vld [vmem:[%s1958_s30 + $0x280] sm:$0xff] }
 0x119   : > { %1257 = vmatpush.msrb.mxu2 %v1226_v24  ;;  %1174 = vmatpush.msrb.mxu0 %v1141_v27  ;;  %v1233_v5 = vld [vmem:[%s1958_s30 + $0x390] sm:$0xff]  ;;  %v1216_v7 = vld [vmem:[%s1958_s30 + $0x308] sm:$0xff]  ;;  %v1215_v11 = vld [vmem:[%s1958_s30 + $0x300] sm:$0xff] }
 0x11a   : > { %1277 = vmatpush.msrb.mxu3 %v1242_v25  ;;  %1194 = vmatpush.msrb.mxu1 %v1157_v28  ;;  %v1082_v0 = vld.sshfl [vmem:[#allocation1] sm:$0xff pattern:$0x73625140]  ;;  %v1083_v1 = vld.sshfl [vmem:[#allocation1 + $0x8] sm:$0xff pattern:$0x73625140] }
 0x11b   : > { %1258 = vmatpush.msrb.mxu2 %v1225_v29  ;;  %1175 = vmatpush.msrb.mxu0 %v1140_v31  ;;  %1164 = vst [vmem:[#allocation1] ss:$4 sm:$0xff] %v1811_v60  ;;  %v1232_v8 = vld [vmem:[%s1958_s30 + $0x388] sm:$0xff]  ;;  %v1231_v13 = vld [vmem:[%s1958_s30 + $0x380] sm:$0xff]  ;;  %v1314_v16 = vld [vmem:[%s1958_s30 + $0x478] sm:$0xff] }
 0x11c   : > { %1278 = vmatpush.msrb.mxu3 %v1241_v30  ;;  %1195 = vmatpush.msrb.mxu1 %v1156_v32  ;;  %v1814_v50 = vld [vmem:[%s2460_s27 + $0xc] sm:$0xf]  ;;  %v1330_v12 = vld [vmem:[%s1958_s30 + $0x4f8] sm:$0xff]  ;;  %v1313_v19 = vld [vmem:[%s1958_s30 + $0x470] sm:$0xff] }
 0x11d   : > { %1259 = vmatpush.msrb.mxu2 %v1224_v33  ;;  %1176 = vmatpush.msrb.mxu0 %v1139_v35  ;;  %v1398_v17 = vld [vmem:[%s1958_s30 + $0x578] sm:$0xff]  ;;  %v1329_v20 = vld [vmem:[%s1958_s30 + $0x4f0] sm:$0xff]  ;;  %v1312_v24 = vld [vmem:[%s1958_s30 + $0x468] sm:$0xff] }
 0x11e   : > { %1279 = vmatpush.msrb.mxu3 %v1240_v34  ;;  %1196 = vmatpush.msrb.mxu1 %v1155_v36  ;;  %v1414_v18 = vld [vmem:[%s1958_s30 + $0x5f8] sm:$0xff]  ;;  %v1397_v21 = vld [vmem:[%s1958_s30 + $0x570] sm:$0xff]  ;;  %v1328_v25 = vld [vmem:[%s1958_s30 + $0x4e8] sm:$0xff] }
 0x11f   : > { %1260 = vmatpush.msrb.mxu2 %v1223_v37  ;;  %1177 = vmatpush.msrb.mxu0 %v1138_v23  ;;  %v1413_v22 = vld [vmem:[%s1958_s30 + $0x5f0] sm:$0xff]  ;;  %v1396_v27 = vld [vmem:[%s1958_s30 + $0x568] sm:$0xff]  ;;  %v1311_v31 = vld [vmem:[%s1958_s30 + $0x460] sm:$0xff] }
 0x120   : > { %1280 = vmatpush.msrb.mxu3 %v1239_v38  ;;  %1197 = vmatpush.msrb.mxu1 %v1154_v40  ;;  %v1817_v26 = vld [vmem:[%s2460_s27 + $0x10] sm:$0xf]  ;;  %v1412_v28 = vld [vmem:[%s1958_s30 + $0x5e8] sm:$0xff]  ;;  %v1327_v32 = vld [vmem:[%s1958_s30 + $0x4e0] sm:$0xff] }
 0x121   : > { %1261 = vmatpush.msrb.mxu2 %v1222_v41  ;;  %1178 = vmatpush.msrb.mxu0 %v1137_v45  ;;  %v1395_v33 = vld [vmem:[%s1958_s30 + $0x560] sm:$0xff]  ;;  %v1310_v35 = vld [vmem:[%s1958_s30 + $0x458] sm:$0xff]  ;;  %v1309_v23 = vld [vmem:[%s1958_s30 + $0x450] sm:$0xff] }
 0x122   : > { %1281 = vmatpush.msrb.mxu3 %v1238_v42  ;;  %1198 = vmatpush.msrb.mxu1 %v1153_v46  ;;  %v1165_v14 = vld.sshfl [vmem:[#allocation1] sm:$0xff pattern:$0x73625140]  ;;  %v1166_v15 = vld.sshfl [vmem:[#allocation1 + $0x8] sm:$0xff pattern:$0x73625140] }
 0x123   : > { %1262 = vmatpush.msrb.mxu2 %v1221_v47  ;;  %1179 = vmatpush.msrb.mxu0 %v1136_v49  ;;  %1248 = vst [vmem:[#allocation1] ss:$4 sm:$0xff] %v1814_v50  ;;  %v1411_v34 = vld [vmem:[%s1958_s30 + $0x5e0] sm:$0xff]  ;;  %v1326_v36 = vld [vmem:[%s1958_s30 + $0x4d8] sm:$0xff]  ;;  %v1325_v39 = vld [vmem:[%s1958_s30 + $0x4d0] sm:$0xff] }
 0x124   : > { %1282 = vmatpush.msrb.mxu3 %v1237_v48  ;;  %1199 = vmatpush.msrb.mxu1 %v1152_v51  ;;  %v1394_v37 = vld [vmem:[%s1958_s30 + $0x558] sm:$0xff]  ;;  %v1393_v40 = vld [vmem:[%s1958_s30 + $0x550] sm:$0xff]  ;;  %v1308_v42 = vld [vmem:[%s1958_s30 + $0x448] sm:$0xff] }
 0x125   : > { %1263 = vmatpush.msrb.mxu2 %v1220_v52  ;;  %1180 = vmatpush.msrb.mxu0 %v1135_v54  ;;  %v1410_v38 = vld [vmem:[%s1958_s30 + $0x5d8] sm:$0xff]  ;;  %v1409_v41 = vld [vmem:[%s1958_s30 + $0x5d0] sm:$0xff]  ;;  %v1392_v45 = vld [vmem:[%s1958_s30 + $0x548] sm:$0xff] }
 0x126   : > { %1283 = vmatpush.msrb.mxu3 %v1236_v53  ;;  %1200 = vmatpush.msrb.mxu1 %v1151_v55  ;;  %v1408_v46 = vld [vmem:[%s1958_s30 + $0x5c8] sm:$0xff]  ;;  %v1307_v49 = vld [vmem:[%s1958_s30 + $0x440] sm:$0xff]  ;;  %v1306_v54 = vld [vmem:[%s1958_s30 + $0x438] sm:$0xff] }
 0x127   : > { %1264 = vmatpush.msrb.mxu2 %v1219_v56  ;;  %1181 = vmatpush.msrb.mxu0 %v1134_v59  ;;  %v1323_v51 = vld [vmem:[%s1958_s30 + $0x4c0] sm:$0xff]  ;;  %v1322_v55 = vld [vmem:[%s1958_s30 + $0x4b8] sm:$0xff]  ;;  %v1305_v60 = vld [vmem:[%s1958_s30 + $0x430] sm:$0xff] }
 0x128   : > { %1284 = vmatpush.msrb.mxu3 %v1235_v58  ;;  %1201 = vmatpush.msrb.mxu1 %v1150_v61  ;;  %v1391_v52 = vld [vmem:[%s1958_s30 + $0x540] sm:$0xff]  ;;  %v1390_v56 = vld [vmem:[%s1958_s30 + $0x538] sm:$0xff]  ;;  %v1321_v61 = vld [vmem:[%s1958_s30 + $0x4b0] sm:$0xff] }
 0x129   : > { %1265 = vmatpush.msrb.mxu2 %v1218_v62  ;;  %1122 = vmatmul.f32.vlgmr.msra.gmra.mxu3 %v1083_v1  ;;  %v1407_v53 = vld [vmem:[%s1958_s30 + $0x5c0] sm:$0xff]  ;;  %v1406_v58 = vld [vmem:[%s1958_s30 + $0x5b8] sm:$0xff]  ;;  %v1389_v62 = vld [vmem:[%s1958_s30 + $0x530] sm:$0xff] }
 0x12a   : > { %1285 = vmatpush.msrb.mxu3 %v1234_v63  ;;  %1102 = vmatmul.f32.vlgmr.msra.gmra.mxu2 %v1082_v0  ;;  %v1249_v29 = vld.sshfl [vmem:[#allocation1] sm:$0xff pattern:$0x73625140]  ;;  %v1250_v30 = vld.sshfl [vmem:[#allocation1 + $0x8] sm:$0xff pattern:$0x73625140] }
 0x12b   : > { %1182 = vmatpush.msrb.mxu0 %v1133_v2  ;;  %1202 = vmatpush.msrb.mxu1 %v1149_v3  ;;  %1332 = vst [vmem:[#allocation1] ss:$4 sm:$0xff] %v1817_v26  ;;  %v1823_v59 = vld [vmem:[%s2460_s27 + $0x18] sm:$0xf]  ;;  %v1405_v63 = vld [vmem:[%s1958_s30 + $0x5b0] sm:$0xff]  ;;  %v1304_v0 = vld [vmem:[%s1958_s30 + $0x428] sm:$0xff] }
 0x12c   : > { %1266 = vmatpush.msrb.mxu2 %v1217_v4  ;;  %1286 = vmatpush.msrb.mxu3 %v1233_v5  ;;  %v1320_v1 = vld [vmem:[%s1958_s30 + $0x4a8] sm:$0xff]  ;;  %v1302_v50 = vld [vmem:[%s1958_s30 + $0x418] sm:$0xff]  ;;  %v1399_v26 = vld [vmem:[%s1958_s30 + $0x580] sm:$0xff] }
 0x12d   : > { %1183 = vmatpush.msrb.mxu0 %v1132_v57  ;;  %1203 = vmatpush.msrb.mxu1 %v1148_v6  ;;  %v1388_v2 = vld [vmem:[%s1958_s30 + $0x528] sm:$0xff]  ;;  %v1303_v57 = vld [vmem:[%s1958_s30 + $0x420] sm:$0xff] }
 0x12e   : > { %1267 = vmatpush.msrb.mxu2 %v1216_v7  ;;  %1287 = vmatpush.msrb.mxu3 %v1232_v8  ;;  %v1404_v3 = vld [vmem:[%s1958_s30 + $0x5a8] sm:$0xff]  ;;  %v1319_v6 = vld [vmem:[%s1958_s30 + $0x4a0] sm:$0xff] }
 0x12f   : > { %1056 = vmatmul.f32.vlgmr.msra.gmra.mxu0 %v2480_v43  ;;  %1076 = vmatmul.f32.vlgmr.msra.gmra.mxu1 %v2482_v44  ;;  %v1820_v43 = vld [vmem:[%s2460_s27 + $0x14] sm:$0xf]  ;;  %v1324_v44 = vld [vmem:[%s1958_s30 + $0x4c8] sm:$0xff]  ;;  %v1387_v7 = vld [vmem:[%s1958_s30 + $0x520] sm:$0xff] }
 0x130   : > { %1184 = vmatpush.msrb.mxu0 %v1131_v9  ;;  %1204 = vmatpush.msrb.mxu1 %v1147_v10  ;;  %v1403_v8 = vld [vmem:[%s1958_s30 + $0x5a0] sm:$0xff]  ;;  %v1318_v9 = vld [vmem:[%s1958_s30 + $0x498] sm:$0xff] }
 0x131   : > { %1268 = vmatpush.msrb.mxu2 %v1215_v11  ;;  %1288 = vmatpush.msrb.mxu3 %v1231_v13  ;;  %v1386_v10 = vld [vmem:[%s1958_s30 + $0x518] sm:$0xff]  ;;  %v1301_v13 = vld [vmem:[%s1958_s30 + $0x410] sm:$0xff] }
 0x132   : > { %1337 = vmatpush.msra.mxu0 %v1314_v16  ;;  %1357 = vmatpush.msra.mxu1 %v1330_v12  ;;  %v2546_v47 = vld.sshfl [vmem:[#allocation1] sm:$0xff pattern:$0x73625140]  ;;  %v2548_v48 = vld.sshfl [vmem:[#allocation1 + $0x8] sm:$0xff pattern:$0x73625140] }
 0x133   : > { %1421 = vmatpush.msra.mxu2 %v1398_v17  ;;  %1441 = vmatpush.msra.mxu3 %v1414_v18  ;;  %1416 = vst [vmem:[#allocation1] ss:$4 sm:$0xff] %v1820_v43  ;;  %v1402_v11 = vld [vmem:[%s1958_s30 + $0x598] sm:$0xff]  ;;  %v1401_v16 = vld [vmem:[%s1958_s30 + $0x590] sm:$0xff]  ;;  %v1300_v12 = vld [vmem:[%s1958_s30 + $0x408] sm:$0xff] }
 0x134   : > { %1338 = vmatpush.msra.mxu0 %v1313_v19  ;;  %1358 = vmatpush.msra.mxu1 %v1329_v20  ;;  %v1316_v17 = vld [vmem:[%s1958_s30 + $0x488] sm:$0xff]  ;;  %v1826_v18 = vld [vmem:[%s2460_s27 + $0x1c] sm:$0xf] }
 0x135   : > { %1422 = vmatpush.msra.mxu2 %v1397_v21  ;;  %1442 = vmatpush.msra.mxu3 %v1413_v22  ;;  %v1384_v19 = vld [vmem:[%s1958_s30 + $0x508] sm:$0xff]  ;;  %v1299_v21 = vld [vmem:[%s1958_s30 + $0x400] sm:$0xff]  ;;  %v1478_v43 = vld [vmem:[%s1958_s30 + $0x658] sm:$0xff] }
 0x136   : > { %1339 = vmatpush.msra.mxu0 %v1312_v24  ;;  %1359 = vmatpush.msra.mxu1 %v1328_v25  ;;  %v1400_v20 = vld [vmem:[%s1958_s30 + $0x588] sm:$0xff]  ;;  %v1315_v22 = vld [vmem:[%s1958_s30 + $0x480] sm:$0xff] }
 0x137   : > { %1269 = vmatmul.f32.vlgmr.msrb.gmra.mxu2 %v1249_v29  ;;  %1289 = vmatmul.f32.vlgmr.msrb.gmra.mxu3 %v1250_v30  ;;  %v1383_v25 = vld [vmem:[%s1958_s30 + $0x500] sm:$0xff]  ;;  %v1498_v29 = vld [vmem:[%s1958_s30 + $0x6f8] sm:$0xff] }
 0x138   : > { %1423 = vmatpush.msra.mxu2 %v1396_v27  ;;  %1443 = vmatpush.msra.mxu3 %v1412_v28  ;;  %v1482_v28 = vld [vmem:[%s1958_s30 + $0x678] sm:$0xff] }
 0x139   : > { %1185 = vmatmul.f32.vlgmr.msrb.gmra.mxu0 %v1165_v14  ;;  %1205 = vmatmul.f32.vlgmr.msrb.gmra.mxu1 %v1166_v15  ;;  %v1317_v14 = vld [vmem:[%s1958_s30 + $0x490] sm:$0xff]  ;;  %v1566_v30 = vld [vmem:[%s1958_s30 + $0x778] sm:$0xff] }
 0x13a   : > { %1340 = vmatpush.msra.mxu0 %v1311_v31  ;;  %1360 = vmatpush.msra.mxu1 %v1327_v32  ;;  %v1417_v4 = vld.sshfl [vmem:[#allocation1] sm:$0xff pattern:$0x73625140]  ;;  %v1418_v5 = vld.sshfl [vmem:[#allocation1 + $0x8] sm:$0xff pattern:$0x73625140] }
 0x13b   : > { %1424 = vmatpush.msra.mxu2 %v1395_v33  ;;  %1444 = vmatpush.msra.mxu3 %v1411_v34  ;;  %1500 = vst [vmem:[#allocation1] ss:$4 sm:$0xff] %v1823_v59  ;;  %v1385_v15 = vld [vmem:[%s1958_s30 + $0x510] sm:$0xff]  ;;  %v1582_v31 = vld [vmem:[%s1958_s30 + $0x7f8] sm:$0xff]  ;;  %v1559_v59 = vld [vmem:[%s1958_s30 + $0x740] sm:$0xff] }
 0x13c   : > { %1341 = vmatpush.msra.mxu0 %v1310_v35  ;;  %1361 = vmatpush.msra.mxu1 %v1326_v36  ;;  %v1481_v32 = vld [vmem:[%s1958_s30 + $0x670] sm:$0xff]  ;;  %v1480_v36 = vld [vmem:[%s1958_s30 + $0x668] sm:$0xff] }
 0x13d   : > { %1425 = vmatpush.msra.mxu2 %v1394_v37  ;;  %1445 = vmatpush.msra.mxu3 %v1410_v38  ;;  %v1497_v33 = vld [vmem:[%s1958_s30 + $0x6f0] sm:$0xff]  ;;  %v1496_v37 = vld [vmem:[%s1958_s30 + $0x6e8] sm:$0xff] }
 0x13e   : > { %1342 = vmatpush.msra.mxu0 %v1309_v23  ;;  %1362 = vmatpush.msra.mxu1 %v1325_v39  ;;  %v1565_v34 = vld [vmem:[%s1958_s30 + $0x770] sm:$0xff]  ;;  %v1564_v38 = vld [vmem:[%s1958_s30 + $0x768] sm:$0xff]  ;;  %v1479_v39 = vld [vmem:[%s1958_s30 + $0x660] sm:$0xff] }
 0x13f   : > { %1426 = vmatpush.msra.mxu2 %v1393_v40  ;;  %1446 = vmatpush.msra.mxu3 %v1409_v41  ;;  %v1581_v35 = vld [vmem:[%s1958_s30 + $0x7f0] sm:$0xff]  ;;  %v1580_v23 = vld [vmem:[%s1958_s30 + $0x7e8] sm:$0xff]  ;;  %v1495_v40 = vld [vmem:[%s1958_s30 + $0x6e0] sm:$0xff] }
 0x140   : > { %1343 = vmatpush.msra.mxu0 %v1308_v42  ;;  %1363 = vmatpush.msra.mxu1 %v1324_v44  ;;  %v1563_v41 = vld [vmem:[%s1958_s30 + $0x760] sm:$0xff]  ;;  %v1494_v44 = vld [vmem:[%s1958_s30 + $0x6d8] sm:$0xff] }
 0x141   : > { %1427 = vmatpush.msra.mxu2 %v1392_v45  ;;  %1447 = vmatpush.msra.mxu3 %v1408_v46  ;;  %v1579_v42 = vld [vmem:[%s1958_s30 + $0x7e0] sm:$0xff]  ;;  %v1562_v45 = vld [vmem:[%s1958_s30 + $0x758] sm:$0xff] }
 0x142   : > { %1344 = vmatpush.msra.mxu0 %v1307_v49  ;;  %1364 = vmatpush.msra.mxu1 %v1323_v51  ;;  %v2586_v24 = vld.sshfl [vmem:[#allocation1] sm:$0xff pattern:$0x73625140]  ;;  %v2590_v27 = vld.sshfl [vmem:[#allocation1 + $0x8] sm:$0xff pattern:$0x73625140] }
 0x143   : > { %1428 = vmatpush.msra.mxu2 %v1391_v52  ;;  %1448 = vmatpush.msra.mxu3 %v1407_v53  ;;  %1584 = vst [vmem:[#allocation1] ss:$4 sm:$0xff] %v1826_v18  ;;  %v1578_v46 = vld [vmem:[%s1958_s30 + $0x7d8] sm:$0xff]  ;;  %v1561_v49 = vld [vmem:[%s1958_s30 + $0x750] sm:$0xff]  ;;  %v1476_v52 = vld [vmem:[%s1958_s30 + $0x648] sm:$0xff] }
 0x144   : > { %1345 = vmatpush.msra.mxu0 %v1306_v54  ;;  %1365 = vmatpush.msra.mxu1 %v1322_v55  ;;  %v1577_v51 = vld [vmem:[%s1958_s30 + $0x7d0] sm:$0xff]  ;;  %v1492_v53 = vld [vmem:[%s1958_s30 + $0x6c8] sm:$0xff] }
 0x145   : > { %1429 = vmatpush.msra.mxu2 %v1390_v56  ;;  %1449 = vmatpush.msra.mxu3 %v1406_v58  ;;  %v1560_v54 = vld [vmem:[%s1958_s30 + $0x748] sm:$0xff]  ;;  %v1475_v56 = vld [vmem:[%s1958_s30 + $0x640] sm:$0xff]  ;;  %v1569_v18 = vld [vmem:[%s1958_s30 + $0x790] sm:$0xff] }
 0x146   : > { %1346 = vmatpush.msra.mxu0 %v1305_v60  ;;  %1366 = vmatpush.msra.mxu1 %v1321_v61  ;;  %v1576_v55 = vld [vmem:[%s1958_s30 + $0x7c8] sm:$0xff]  ;;  %v1491_v58 = vld [vmem:[%s1958_s30 + $0x6c0] sm:$0xff]  ;;  %v1474_v61 = vld [vmem:[%s1958_s30 + $0x638] sm:$0xff] }
 0x147   : > { %1430 = vmatpush.msra.mxu2 %v1389_v62  ;;  %1450 = vmatpush.msra.mxu3 %v1405_v63  ;;  %v1575_v60 = vld [vmem:[%s1958_s30 + $0x7c0] sm:$0xff]  ;;  %v1490_v62 = vld [vmem:[%s1958_s30 + $0x6b8] sm:$0xff] }
 0x148   : > { %1347 = vmatpush.msra.mxu0 %v1304_v0  ;;  %1367 = vmatpush.msra.mxu1 %v1320_v1  ;;  %v1558_v63 = vld [vmem:[%s1958_s30 + $0x738] sm:$0xff]  ;;  %v1473_v1 = vld [vmem:[%s1958_s30 + $0x630] sm:$0xff] }
 0x149   : > { %1431 = vmatpush.msra.mxu2 %v1388_v2  ;;  %1451 = vmatpush.msra.mxu3 %v1404_v3  ;;  %v1574_v0 = vld [vmem:[%s1958_s30 + $0x7b8] sm:$0xff]  ;;  %v1489_v2 = vld [vmem:[%s1958_s30 + $0x6b0] sm:$0xff] }
 0x14a   : > { %1348 = vmatpush.msra.mxu0 %v1303_v57  ;;  %1368 = vmatpush.msra.mxu1 %v1319_v6  ;;  %v1557_v3 = vld [vmem:[%s1958_s30 + $0x730] sm:$0xff]  ;;  %v1488_v57 = vld [vmem:[%s1958_s30 + $0x6a8] sm:$0xff] }
 0x14b   : > { %1432 = vmatpush.msra.mxu2 %v1387_v7  ;;  %1452 = vmatpush.msra.mxu3 %v1403_v8  ;;  %v1556_v6 = vld [vmem:[%s1958_s30 + $0x728] sm:$0xff]  ;;  %v1471_v8 = vld [vmem:[%s1958_s30 + $0x620] sm:$0xff] }
 0x14c   : > { %1349 = vmatpush.msra.mxu0 %v1302_v50  ;;  %1369 = vmatpush.msra.mxu1 %v1318_v9  ;;  %v1572_v7 = vld [vmem:[%s1958_s30 + $0x7a8] sm:$0xff]  ;;  %v1487_v50 = vld [vmem:[%s1958_s30 + $0x6a0] sm:$0xff] }
 0x14d   : > { %1433 = vmatpush.msra.mxu2 %v1386_v10  ;;  %1453 = vmatpush.msra.mxu3 %v1402_v11  ;;  %v1555_v9 = vld [vmem:[%s1958_s30 + $0x720] sm:$0xff]  ;;  %v1470_v11 = vld [vmem:[%s1958_s30 + $0x618] sm:$0xff] }
 0x14e   : > { %1350 = vmatpush.msra.mxu0 %v1301_v13  ;;  %1370 = vmatpush.msra.mxu1 %v1317_v14  ;;  %v1571_v10 = vld [vmem:[%s1958_s30 + $0x7a0] sm:$0xff]  ;;  %v1486_v13 = vld [vmem:[%s1958_s30 + $0x698] sm:$0xff] }
 0x14f   : > { %1434 = vmatpush.msra.mxu2 %v1385_v15  ;;  %1454 = vmatpush.msra.mxu3 %v1401_v16  ;;  %v1554_v14 = vld [vmem:[%s1958_s30 + $0x718] sm:$0xff]  ;;  %v1469_v16 = vld [vmem:[%s1958_s30 + $0x610] sm:$0xff] }
 0x150   : > { %1351 = vmatpush.msra.mxu0 %v1300_v12  ;;  %1371 = vmatpush.msra.mxu1 %v1316_v17  ;;  %v1570_v15 = vld [vmem:[%s1958_s30 + $0x798] sm:$0xff]  ;;  %v1485_v12 = vld [vmem:[%s1958_s30 + $0x690] sm:$0xff] }
 0x151   : > { %1435 = vmatpush.msra.mxu2 %v1384_v19  ;;  %1455 = vmatpush.msra.mxu3 %v1400_v20  ;;  %v1553_v17 = vld [vmem:[%s1958_s30 + $0x710] sm:$0xff]  ;;  %v1468_v19 = vld [vmem:[%s1958_s30 + $0x608] sm:$0xff] }
 0x152   : > { %1352 = vmatpush.msra.mxu0 %v1299_v21  ;;  %1372 = vmatpush.msra.mxu1 %v1315_v22  ;;  %v1484_v20 = vld [vmem:[%s1958_s30 + $0x688] sm:$0xff] }
 0x153   : > { %1436 = vmatpush.msra.mxu2 %v1383_v25  ;;  %1456 = vmatpush.msra.mxu3 %v1399_v26  ;;  %v1552_v21 = vld [vmem:[%s1958_s30 + $0x708] sm:$0xff]  ;;  %v1467_v25 = vld [vmem:[%s1958_s30 + $0x600] sm:$0xff] }
 0x154   : > { %1353 = vmatmul.f32.vlgmr.msra.gmra.mxu0 %v2546_v47  ;;  %1373 = vmatmul.f32.vlgmr.msra.gmra.mxu1 %v2548_v48  ;;  %v1477_v47 = vld [vmem:[%s1958_s30 + $0x650] sm:$0xff]  ;;  %v1568_v22 = vld [vmem:[%s1958_s30 + $0x788] sm:$0xff]  ;;  %v1483_v26 = vld [vmem:[%s1958_s30 + $0x680] sm:$0xff] }
 0x155   : > { %1437 = vmatmul.f32.vlgmr.msra.gmra.mxu2 %v1417_v4  ;;  %1457 = vmatmul.f32.vlgmr.msra.gmra.mxu3 %v1418_v5  ;;  %v1493_v48 = vld [vmem:[%s1958_s30 + $0x6d0] sm:$0xff]  ;;  %v1472_v5 = vld [vmem:[%s1958_s30 + $0x628] sm:$0xff] }
 0x156   : > { %1505 = vmatpush.msrb.mxu0 %v1482_v28  ;;  %1525 = vmatpush.msrb.mxu1 %v1498_v29  ;;  %v1573_v4 = vld [vmem:[%s1958_s30 + $0x7b0] sm:$0xff]  ;;  %v1551_v28 = vld [vmem:[%s1958_s30 + $0x700] sm:$0xff] }
 0x157   : > { %1589 = vmatpush.msrb.mxu2 %v1566_v30  ;;  %1609 = vmatpush.msrb.mxu3 %v1582_v31  ;;  %v1567_v29 = vld [vmem:[%s1958_s30 + $0x780] sm:$0xff]  ;;  %v1586_v31 = vld.sshfl [vmem:[#allocation1 + $0x8] sm:$0xff pattern:$0x73625140] }
 0x158   : > { %1506 = vmatpush.msrb.mxu0 %v1481_v32  ;;  %1526 = vmatpush.msrb.mxu1 %v1497_v33  ;;  %v1585_v30 = vld.sshfl [vmem:[#allocation1] sm:$0xff pattern:$0x73625140] }
 0x159   : > { %1590 = vmatpush.msrb.mxu2 %v1565_v34  ;;  %1610 = vmatpush.msrb.mxu3 %v1581_v35 }
 0x15a   : > { %1507 = vmatpush.msrb.mxu0 %v1480_v36  ;;  %1527 = vmatpush.msrb.mxu1 %v1496_v37 }
 0x15b   : > { %1591 = vmatpush.msrb.mxu2 %v1564_v38  ;;  %1611 = vmatpush.msrb.mxu3 %v1580_v23 }
 0x15c   : > { %1508 = vmatpush.msrb.mxu0 %v1479_v39  ;;  %1528 = vmatpush.msrb.mxu1 %v1495_v40 }
 0x15d   : > { %1592 = vmatpush.msrb.mxu2 %v1563_v41  ;;  %1612 = vmatpush.msrb.mxu3 %v1579_v42 }
 0x15e   : > { %1509 = vmatpush.msrb.mxu0 %v1478_v43  ;;  %1529 = vmatpush.msrb.mxu1 %v1494_v44 }
 0x15f   : > { %1593 = vmatpush.msrb.mxu2 %v1562_v45  ;;  %1613 = vmatpush.msrb.mxu3 %v1578_v46 }
 0x160   : > { %1510 = vmatpush.msrb.mxu0 %v1477_v47  ;;  %1530 = vmatpush.msrb.mxu1 %v1493_v48 }
 0x161   : > { %1594 = vmatpush.msrb.mxu2 %v1561_v49  ;;  %1614 = vmatpush.msrb.mxu3 %v1577_v51 }
 0x162   : > { %1511 = vmatpush.msrb.mxu0 %v1476_v52  ;;  %1531 = vmatpush.msrb.mxu1 %v1492_v53 }
 0x163   : > { %1595 = vmatpush.msrb.mxu2 %v1560_v54  ;;  %1615 = vmatpush.msrb.mxu3 %v1576_v55 }
 0x164   : > { %1512 = vmatpush.msrb.mxu0 %v1475_v56  ;;  %1532 = vmatpush.msrb.mxu1 %v1491_v58 }
 0x165   : > { %1596 = vmatpush.msrb.mxu2 %v1559_v59  ;;  %1616 = vmatpush.msrb.mxu3 %v1575_v60 }
 0x166   : > { %1513 = vmatpush.msrb.mxu0 %v1474_v61  ;;  %1533 = vmatpush.msrb.mxu1 %v1490_v62  ;;  %v1630_v61 = vld [vmem:[#allocation3] sm:$0x3] }
 0x167   : > { %1597 = vmatpush.msrb.mxu2 %v1558_v63  ;;  %1617 = vmatpush.msrb.mxu3 %v1574_v0 }
 0x168   : > { %1514 = vmatpush.msrb.mxu0 %v1473_v1  ;;  %1534 = vmatpush.msrb.mxu1 %v1489_v2 }
 0x169   : > { %1598 = vmatpush.msrb.mxu2 %v1557_v3  ;;  %1618 = vmatpush.msrb.mxu3 %v1573_v4 }
 0x16a   : > { %1515 = vmatpush.msrb.mxu0 %v1472_v5  ;;  %1535 = vmatpush.msrb.mxu1 %v1488_v57 }
 0x16b   : > { %1599 = vmatpush.msrb.mxu2 %v1556_v6  ;;  %1619 = vmatpush.msrb.mxu3 %v1572_v7 }
 0x16c   : > { %1516 = vmatpush.msrb.mxu0 %v1471_v8  ;;  %1536 = vmatpush.msrb.mxu1 %v1487_v50 }
 0x16d   : > { %1600 = vmatpush.msrb.mxu2 %v1555_v9  ;;  %1620 = vmatpush.msrb.mxu3 %v1571_v10 }
 0x16e   : > { %1517 = vmatpush.msrb.mxu0 %v1470_v11  ;;  %1537 = vmatpush.msrb.mxu1 %v1486_v13 }
 0x16f   : > { %1601 = vmatpush.msrb.mxu2 %v1554_v14  ;;  %1621 = vmatpush.msrb.mxu3 %v1570_v15 }
 0x170   : > { %1518 = vmatpush.msrb.mxu0 %v1469_v16  ;;  %1538 = vmatpush.msrb.mxu1 %v1485_v12 }
 0x171   : > { %1602 = vmatpush.msrb.mxu2 %v1553_v17  ;;  %1622 = vmatpush.msrb.mxu3 %v1569_v18 }
 0x172   : > { %1519 = vmatpush.msrb.mxu0 %v1468_v19  ;;  %1539 = vmatpush.msrb.mxu1 %v1484_v20 }
 0x173   : > { %1603 = vmatpush.msrb.mxu2 %v1552_v21  ;;  %1623 = vmatpush.msrb.mxu3 %v1568_v22 }
 0x174   : > { %1520 = vmatpush.msrb.mxu0 %v1467_v25  ;;  %1540 = vmatpush.msrb.mxu1 %v1483_v26 }
 0x175   : > { %1604 = vmatpush.msrb.mxu2 %v1551_v28  ;;  %1624 = vmatpush.msrb.mxu3 %v1567_v29 }
 0x176   : > { %1521 = vmatmul.f32.vlgmr.msrb.gmra.mxu0 %v2586_v24  ;;  %1541 = vmatmul.f32.vlgmr.msrb.gmra.mxu1 %v2590_v27 }
 0x177   : > { %1605 = vmatmul.f32.vlgmr.msrb.gmra.mxu2 %v1585_v30  ;;  %1625 = vmatmul.f32.vlgmr.msrb.gmra.mxu3 %v1586_v31 }
 0x1ac   : > { %v1057_v32 = vpop.f32.mrf.mxu0  ;;  %v1077_v33 = vpop.f32.mrf.mxu1 }
 0x1ad   : > { %v1103_v34 = vpop.f32.mrf.mxu2  ;;  %v1123_v35 = vpop.f32.mrf.mxu3  ;;  %v1078_v38 = vadd.f32 %v1077_v33, %v1057_v32 }
 0x1af   : > { %v1104_v23 = vadd.f32 %v1103_v34, %v1078_v38 }
 0x1b1   : > { %v1124_v43 = vadd.f32 %v1123_v35, %v1104_v23 }
 0x1b6   : > { %v1186_v36 = vpop.f32.mrf.mxu0  ;;  %v1206_v37 = vpop.f32.mrf.mxu1 }
 0x1b7   : > { %v1207_v44 = vadd.f32 %v1206_v37, %v1186_v36 }
 0x1b9   : > { %v1209_v45 = vadd.f32 %v1207_v44, %v1124_v43 }
 0x1ba   : > { %v1270_v39 = vpop.f32.mrf.mxu2  ;;  %v1290_v40 = vpop.f32.mrf.mxu3 }
 0x1bb   : > { %v1291_v24 = vadd.f32 %v1290_v40, %v1270_v39 }
 0x1bd   : > { %v1293_v51 = vadd.f32 %v1291_v24, %v1209_v45 }
 0x1d1   : > { %v1354_v41 = vpop.f32.mrf.mxu0  ;;  %v1374_v42 = vpop.f32.mrf.mxu1 }
 0x1d2   : > { %v1375_v47 = vadd.f32 %v1374_v42, %v1354_v41 }
 0x1d4   : > { %v1377_v53 = vadd.f32 %v1375_v47, %v1293_v51 }
 0x1d8   : > { %v1438_v46 = vpop.f32.mrf.mxu2  ;;  %v1458_v27 = vpop.f32.mrf.mxu3 }
 0x1d9   : > { %v1459_v52 = vadd.f32 %v1458_v27, %v1438_v46 }
 0x1db   : > { %v1461_v55 = vadd.f32 %v1459_v52, %v1377_v53 }
 0x1f3   : > { %v1522_v48 = vpop.f32.mrf.mxu0  ;;  %v1542_v49 = vpop.f32.mrf.mxu1 }
 0x1f4   : > { %v1543_v54 = vadd.f32 %v1542_v49, %v1522_v48 }
 0x1f6   : > { %v1545_v59 = vadd.f32 %v1543_v54, %v1461_v55 }
 0x1fa   : > { %v1606_v56 = vpop.f32.mrf.mxu2  ;;  %v1626_v58 = vpop.f32.mrf.mxu3 }
 0x1fb   : > { %v1627_v60 = vadd.f32 %v1626_v58, %v1606_v56 }
 0x1fd   : > { %v1629_v62 = vadd.f32 %v1627_v60, %v1545_v59  ;;  %1636 = sbr.rel (%p1827_p5) target bundleno = 675 (0x2a3), region = 56 }
 0x1ff   : > { %v1631_v63 = vadd.f32 %v1630_v61, %v1629_v62 }
 0x201   : > { %1632 = vst [vmem:[#allocation3] sm:$0x3] %v1631_v63 }
 0x202   : > { %v1659_v0 = vld [vmem:[%s2727_s5 + $0x78] sm:$0xff]  ;;  %v1658_v1 = vld [vmem:[%s2727_s5 + $0x70] sm:$0xff]  ;;  %v1657_v2 = vld [vmem:[%s2727_s5 + $0x68] sm:$0xff]  ;;  %vm1684_vm10 = vcmask 74752  }
 0x203   : > { %1664 = vmatpush.msra.mxu0 %v1659_v0  ;;  %v1656_v3 = vld [vmem:[%s2727_s5 + $0x60] sm:$0xff]  ;;  %v1655_v4 = vld [vmem:[%s2727_s5 + $0x58] sm:$0xff]  ;;  %v1654_v5 = vld [vmem:[%s2727_s5 + $0x50] sm:$0xff] }
 0x204   : > { %v1653_v57 = vld [vmem:[%s2727_s5 + $0x48] sm:$0xff]  ;;  %v1652_v6 = vld [vmem:[%s2727_s5 + $0x40] sm:$0xff]  ;;  %v1651_v7 = vld [vmem:[%s2727_s5 + $0x38] sm:$0xff] }
 0x205   : > { %1665 = vmatpush.msra.mxu0 %v1658_v1  ;;  %v1650_v8 = vld [vmem:[%s2727_s5 + $0x30] sm:$0xff]  ;;  %v1649_v50 = vld [vmem:[%s2727_s5 + $0x28] sm:$0xff]  ;;  %v1648_v9 = vld [vmem:[%s2727_s5 + $0x20] sm:$0xff] }
 0x206   : > { %v1859_v10 = vld [vmem:[%s2726_s4] ss:$0 sm:$0xff]  ;;  %v1647_v13 = vld [vmem:[%s2727_s5 + $0x18] sm:$0xff]  ;;  %v1646_v14 = vld [vmem:[%s2727_s5 + $0x10] sm:$0xff] }
 0x207   : > { %1666 = vmatpush.msra.mxu0 %v1657_v2  ;;  %v1645_v16 = vld [vmem:[%s2727_s5 + $0x8] sm:$0xff]  ;;  %v1644_v12 = vld [vmem:[%s2727_s5] sm:$0xff] }
 0x208   : > { %v1637_v11 = vld [vmem:[#allocation3] sm:$0x3]  ;;  %v1860_v18 = vld [vmem:[%s2728_s6] ss:$0 sm:$0xff] }
 0x209   : > { %1667 = vmatpush.msra.mxu0 %v1656_v3  ;;  %v1642_v15 = vadd.f32 %v1859_v10, %v1637_v11 }
 0x20b   : > { %1668 = vmatpush.msra.mxu0 %v1655_v4  ;;  %v1643_v17 = vmax.f32 %v1642_v15, 0.0 }
 0x20d   : > { %1669 = vmatpush.msra.mxu0 %v1654_v5 }
 0x20f   : > { %1670 = vmatpush.msra.mxu0 %v1653_v57 }
 0x211   : > { %1671 = vmatpush.msra.mxu0 %v1652_v6 }
 0x213   : > { %1672 = vmatpush.msra.mxu0 %v1651_v7 }
 0x215   : > { %1673 = vmatpush.msra.mxu0 %v1650_v8 }
 0x217   : > { %1674 = vmatpush.msra.mxu0 %v1649_v50 }
 0x219   : > { %1675 = vmatpush.msra.mxu0 %v1648_v9 }
 0x21b   : > { %1676 = vmatpush.msra.mxu0 %v1647_v13 }
 0x21d   : > { %1677 = vmatpush.msra.mxu0 %v1646_v14 }
 0x21f   : > { %1678 = vmatpush.msra.mxu0 %v1645_v16 }
 0x221   : > { %1679 = vmatpush.msra.mxu0 %v1644_v12 }
 0x222   : > { %1680 = vmatmul.f32.vlgmr.msra.gmra.mxu0 %v1643_v17 }
 0x29f   : > { %v1681_v19 = vpop.f32.mrf.mxu0 }
 0x2a0   : > { %v1682_v20 = vadd.f32 %v1860_v18, %v1681_v19 }
 0x2a2   : > { %1685 = vst.msk [vmem:[#allocation4] sm:$0x3] %vm1684_vm10, %v1682_v20 }
 0x2a3 PF: > { %p1845_p6 = scmp.eq.s32.totalorder %s1950_s25, 1  ;;  %s1903_s20 = smov [#allocation4]  }
 0x2a4   : > { %s1692_s21 = sshll.u32 %s1903_s20, 4  ;;  %s1694_s26 = sshll.u32 %s2729_s7, 4  ;;  %s1693_s21 = int_to_ptr.vmem [resolvable:$true] %s1692_s21  ;;  %s1695_s26 = int_to_ptr.hbm [resolvable:$true] %s1694_s26 }
 0x2a5   : > { %1842 = dma.vmem_to_hbm [thread:$0]  (%p1845_p6), %s1693_s21, 32, %s1695_s26, [#allocation5]  }
 0x2a6   : > { %1894 = dma.done.wait (%p1845_p6), [#allocation5], 32  }
 0x2a7   : > { %1896 = vsyncadd (%p1845_p6), [#allocation5], 4294967264 }
 0x2a8 PF: > { %s18_s24 = sadd.s32 1, %s1899_s24  }
 0x2a9   : > { %p15_p7 = scmp.ge.s32.totalorder %s18_s24, 4  }
 0x2ab   :  { %17 = sbr.rel (!%p15_p7) target bundleno = 1 (0x1), region = 122 }
 0x2b0   :  { %1708 = vsyncpa [#allocation5], 1 }
 0x2b1   :  { %1710 = vsyncpa [#allocation5 + $0x1], 1 }

</bundles_post_ra>
